<compile_context>
chip_gen: v5e
topology: v5e:2x2
jax: 0.10.0
libtpu: 0.0.40
codegen_flags: <defaults>
</compile_context>

<pallas_src>
import jax
import jax.numpy as jnp
from jax.experimental import pallas as pl
from jax.experimental.pallas import tpu as pltpu

_SQRT_2_OVER_PI = 0.7978845608028654


def _gelu_tanh(x):
    return 0.5 * x * (1.0 + jnp.tanh(_SQRT_2_OVER_PI * (x + 0.044715 * (x * x * x))))


def _pipeline_mlp_kernel(x_ref, wc_ref, bc_ref, w1_ref, b1_ref, w2_ref, b2_ref,
                         h_ref, o_ref):
    # x_ref:  (1, p*p, C_in, dim)   space-to-depth'd input, one batch element
    # wc_ref: (C_out, C_in)         1x1 conv weight
    # bc_ref: (C_out, 1)            1x1 conv bias
    # w1_ref: (dim, HID)  b1_ref: (1, HID)
    # w2_ref: (HID, OUT)  b2_ref: (1, OUT)
    # h_ref:  (1, C_out, HID)       fc1 output ("energy", pre-GELU)
    # o_ref:  (1, C_out, OUT)       fc2 output
    pp = x_ref.shape[1]
    wc = wc_ref[...]

    # 1x1 conv on every pooling tap + running elementwise max == maxpool(conv(x)).
    pooled = None
    for k in range(pp):
        yk = jnp.dot(wc, x_ref[0, k], preferred_element_type=jnp.float32)  # (C_out, dim)
        pooled = yk if pooled is None else jnp.maximum(pooled, yk)

    # conv bias (constant over the pooling window, so add after the max) + ReLU.
    act = jnp.maximum(pooled + bc_ref[...], 0.0)                           # (C_out, dim)

    # fc1 (-> energy output), GELU, fc2.
    h = jnp.dot(act, w1_ref[...], preferred_element_type=jnp.float32) + b1_ref[...]
    h_ref[0] = h.astype(h_ref.dtype)

    g = _gelu_tanh(h)
    o = jnp.dot(g, w2_ref[...], preferred_element_type=jnp.float32) + b2_ref[...]
    o_ref[0] = o.astype(o_ref.dtype)


def pipeline_mlp_forward(x, pool_size, params):
    """One ConcentrationPipeline + MLP, fused into a single pallas_call."""
    B, C_in, H, W = x.shape
    p = int(pool_size)
    Ho, Wo = H // p, W // p
    dim = Ho * Wo
    C_out = params["w_comp"].shape[0]
    HID = params["w1"].shape[1]
    OUT = params["w2"].shape[1]

    # Crop to whole pooling windows (MaxPool2d floor behaviour), then space-to-depth:
    # (B, C, H, W) -> (B, p*p, C_in, Ho*Wo)  with the spatial dim dense in lanes.
    xc = x[:, :, :Ho * p, :Wo * p]
    x_pre = xc.reshape(B, C_in, Ho, p, Wo, p)
    x_pre = jnp.transpose(x_pre, (0, 3, 5, 1, 2, 4)).reshape(B, p * p, C_in, dim)

    wc = params["w_comp"]                       # (C_out, C_in)
    bc = params["b_comp"].reshape(C_out, 1)
    w1 = params["w1"]                           # (dim, HID)
    b1 = params["b1"].reshape(1, HID)
    w2 = params["w2"]                           # (HID, OUT)
    b2 = params["b2"].reshape(1, OUT)

    def full(shape):
        return pl.BlockSpec(shape, lambda b, _n=len(shape): (0,) * _n)

    h_out, y_out = pl.pallas_call(
        _pipeline_mlp_kernel,
        out_shape=(jax.ShapeDtypeStruct((B, C_out, HID), jnp.float32),
                   jax.ShapeDtypeStruct((B, C_out, OUT), jnp.float32)),
        grid=(B,),
        in_specs=[
            pl.BlockSpec((1, p * p, C_in, dim), lambda b: (b, 0, 0, 0)),
            full((C_out, C_in)),
            full((C_out, 1)),
            full((dim, HID)),
            full((1, HID)),
            full((HID, OUT)),
            full((1, OUT)),
        ],
        out_specs=(pl.BlockSpec((1, C_out, HID), lambda b: (b, 0, 0)),
                   pl.BlockSpec((1, C_out, OUT), lambda b: (b, 0, 0))),
        compiler_params=pltpu.CompilerParams(
            dimension_semantics=("parallel",)),
    )(x_pre, wc, bc, w1, b1, w2, b2)

    # torch: fc2(...).flatten(-2,-1)  and  x_out = fc1(...).flatten(-2,-1)
    return y_out.reshape(B, C_out * OUT), h_out.reshape(B, C_out * HID)


def extraction_block_forward(x, pool_sizes, pipelines_params):
    """Pallas implementation of ExtractionBlock.forward (inference semantics)."""
    outs, energies = [], []
    for p, prm in zip(pool_sizes, pipelines_params):
        o, e = pipeline_mlp_forward(x, p, prm)
        outs.append(o)
        energies.append(e)
    return jnp.concatenate(outs, axis=1), energies


def reference_forward(x, pool_sizes, pipelines_params):
    """Pure-JAX reference for validation."""
    outs, energies = [], []
    B, _, H, W = x.shape
    for p, pr in zip(pool_sizes, pipelines_params):
        Ho, Wo = H // p, W // p
        y = jnp.einsum("oc,bchw->bohw", pr["w_comp"], x) \
            + pr["b_comp"][None, :, None, None]
        y = y[:, :, :Ho * p, :Wo * p].reshape(B, -1, Ho, p, Wo, p).max(axis=(3, 5))
        y = jnp.maximum(y, 0.0).reshape(B, -1, Ho * Wo)
        h = jnp.einsum("bcd,dh->bch", y, pr["w1"]) + pr["b1"][None, None, :]
        energies.append(h.reshape(B, -1))
        g = _gelu_tanh(h)
        o = jnp.einsum("bch,hk->bck", g, pr["w2"]) + pr["b2"][None, None, :]
        outs.append(o.reshape(B, -1))
    return jnp.concatenate(outs, axis=1), energies


def make_params(key, in_filters, p_comp, in_img_size, pool_sizes,
                hidden_features=1024, out_features=128):
    """Random params in (transposed-from-)PyTorch layouts."""
    c_out = in_filters // p_comp
    plist = []
    for i, p in enumerate(pool_sizes):
        dim = (in_img_size // p) ** 2
        k = jax.random.fold_in(key, i)
        k1, k2, k3, k4, k5, k6 = jax.random.split(k, 6)
        # torch: comp.weight (C_out, C_in, 1, 1); fc.weight (out_features, in_features)
        w_comp_pt = jax.random.normal(k1, (c_out, in_filters, 1, 1), jnp.float32) * 0.2
        fc1_w_pt = jax.random.normal(k2, (hidden_features, dim), jnp.float32) * (dim ** -0.5)
        fc2_w_pt = jax.random.normal(k3, (out_features, hidden_features),
                                     jnp.float32) * (hidden_features ** -0.5)
        plist.append({
            "w_comp": w_comp_pt[:, :, 0, 0],   # (C_out, C_in)
            "b_comp": 0.1 * jax.random.normal(k4, (c_out,), jnp.float32),
            "w1": fc1_w_pt.T,                  # (dim, hidden)
            "b1": 0.1 * jax.random.normal(k5, (hidden_features,), jnp.float32),
            "w2": fc2_w_pt.T,                  # (hidden, out)
            "b2": 0.1 * jax.random.normal(k6, (out_features,), jnp.float32),
        })
    return plist


if __name__ == "__main__":
    key = jax.random.PRNGKey(0)
    kx, kp = jax.random.split(key)

    # Small shapes consistent with the module: in_filters=8, p_comp=2 -> C_comp=4,
    # img 16x16, two pooling scales, p_drop=0 (dropout is identity at inference).
    B, in_filters, img = 2, 8, 16
    p_comp = 2
    pool_sizes = (2, 4)

    x = jax.random.normal(kx, (B, in_filters, img, img), jnp.float32)
    params = make_params(kp, in_filters, p_comp, img, pool_sizes)

    fwd = jax.jit(lambda xx, pp: extraction_block_forward(xx, pool_sizes, pp))
    out, energies = fwd(x, params)
    out = jax.block_until_ready(out)

    ref_out, ref_energies = reference_forward(x, pool_sizes, params)

    c_comp = in_filters // p_comp
    assert out.shape == (B, c_comp * 128 * len(pool_sizes)), out.shape
    assert jnp.allclose(out, ref_out, atol=2e-2, rtol=2e-2), "output mismatch vs reference"
    for e, re_ in zip(energies, ref_energies):
        assert e.shape == (B, c_comp * 1024)
        assert jnp.allclose(e, re_, atol=2e-2, rtol=2e-2), "energy mismatch vs reference"

    print("KERNEL_OK")
</pallas_src>

<mosaic_0001>
module attributes {stable_mosaic.version = 11 : i64} {
  func.func @_pipeline_mlp_kernel(%arg0: i32, %arg1: memref<1x4x8x64xf32, #tpu.memory_space<vmem>>, %arg2: memref<4x8xf32, #tpu.memory_space<vmem>>, %arg3: memref<4x1xf32, #tpu.memory_space<vmem>>, %arg4: memref<64x1024xf32, #tpu.memory_space<vmem>>, %arg5: memref<1x1024xf32, #tpu.memory_space<vmem>>, %arg6: memref<1024x128xf32, #tpu.memory_space<vmem>>, %arg7: memref<1x128xf32, #tpu.memory_space<vmem>>, %arg8: memref<1x4x1024xf32, #tpu.memory_space<vmem>>, %arg9: memref<1x4x128xf32, #tpu.memory_space<vmem>>) attributes {dimension_semantics = [#tpu.dimension_semantics<parallel>], iteration_bounds = array<i64: 2>, scalar_prefetch = 0 : i64, scratch_operands = 0 : i64, tpu.core_type = #tpu.core_type<tc>, window_params = [{transform_indices = @transform_0, window_bounds = array<i64: 1, 4, 8, 64>}, {pipeline_mode = #tpu.pipeline_mode<synchronous>, transform_indices = @transform_1, window_bounds = array<i64: 4, 8>}, {pipeline_mode = #tpu.pipeline_mode<synchronous>, transform_indices = @transform_2, window_bounds = array<i64: 4, 1>}, {pipeline_mode = #tpu.pipeline_mode<synchronous>, transform_indices = @transform_3, window_bounds = array<i64: 64, 1024>}, {pipeline_mode = #tpu.pipeline_mode<synchronous>, transform_indices = @transform_4, window_bounds = array<i64: 1, 1024>}, {pipeline_mode = #tpu.pipeline_mode<synchronous>, transform_indices = @transform_5, window_bounds = array<i64: 1024, 128>}, {pipeline_mode = #tpu.pipeline_mode<synchronous>, transform_indices = @transform_6, window_bounds = array<i64: 1, 128>}, {transform_indices = @transform_7, window_bounds = array<i64: 1, 4, 1024>}, {transform_indices = @transform_8, window_bounds = array<i64: 1, 4, 128>}]} {
    %c0 = arith.constant 0 : index
    %c0_0 = arith.constant 0 : index
    %0 = vector.load %arg2[%c0, %c0_0] : memref<4x8xf32, #tpu.memory_space<vmem>>, vector<4x8xf32>
    %c0_1 = arith.constant 0 : index
    %c0_2 = arith.constant 0 : index
    %c0_3 = arith.constant 0 : index
    %c0_4 = arith.constant 0 : index
    %1 = vector.load %arg1[%c0_1, %c0_2, %c0_3, %c0_4] : memref<1x4x8x64xf32, #tpu.memory_space<vmem>>, vector<1x1x8x64xf32>
    %2 = vector.shape_cast %1 : vector<1x1x8x64xf32> to vector<8x64xf32>
    %cst = arith.constant dense<0.000000e+00> : vector<4x64xf32>
    %3 = tpu.matmul %0, %2, %cst {dimension_numbers = #tpu.dot_dimension_numbers<[1], [0], [0], [1], [0, 0, 1, 1], [], []>} : vector<4x8xf32>, vector<8x64xf32>, vector<4x64xf32> -> vector<4x64xf32>
    %c0_5 = arith.constant 0 : index
    %c1 = arith.constant 1 : index
    %c0_6 = arith.constant 0 : index
    %c0_7 = arith.constant 0 : index
    %4 = vector.load %arg1[%c0_5, %c1, %c0_6, %c0_7] : memref<1x4x8x64xf32, #tpu.memory_space<vmem>>, vector<1x1x8x64xf32>
    %5 = vector.shape_cast %4 : vector<1x1x8x64xf32> to vector<8x64xf32>
    %cst_8 = arith.constant dense<0.000000e+00> : vector<4x64xf32>
    %6 = tpu.matmul %0, %5, %cst_8 {dimension_numbers = #tpu.dot_dimension_numbers<[1], [0], [0], [1], [0, 0, 1, 1], [], []>} : vector<4x8xf32>, vector<8x64xf32>, vector<4x64xf32> -> vector<4x64xf32>
    %7 = arith.maximumf %3, %6 : vector<4x64xf32>
    %c0_9 = arith.constant 0 : index
    %c2 = arith.constant 2 : index
    %c0_10 = arith.constant 0 : index
    %c0_11 = arith.constant 0 : index
    %8 = vector.load %arg1[%c0_9, %c2, %c0_10, %c0_11] : memref<1x4x8x64xf32, #tpu.memory_space<vmem>>, vector<1x1x8x64xf32>
    %9 = vector.shape_cast %8 : vector<1x1x8x64xf32> to vector<8x64xf32>
    %cst_12 = arith.constant dense<0.000000e+00> : vector<4x64xf32>
    %10 = tpu.matmul %0, %9, %cst_12 {dimension_numbers = #tpu.dot_dimension_numbers<[1], [0], [0], [1], [0, 0, 1, 1], [], []>} : vector<4x8xf32>, vector<8x64xf32>, vector<4x64xf32> -> vector<4x64xf32>
    %11 = arith.maximumf %7, %10 : vector<4x64xf32>
    %c0_13 = arith.constant 0 : index
    %c3 = arith.constant 3 : index
    %c0_14 = arith.constant 0 : index
    %c0_15 = arith.constant 0 : index
    %12 = vector.load %arg1[%c0_13, %c3, %c0_14, %c0_15] : memref<1x4x8x64xf32, #tpu.memory_space<vmem>>, vector<1x1x8x64xf32>
    %13 = vector.shape_cast %12 : vector<1x1x8x64xf32> to vector<8x64xf32>
    %cst_16 = arith.constant dense<0.000000e+00> : vector<4x64xf32>
    %14 = tpu.matmul %0, %13, %cst_16 {dimension_numbers = #tpu.dot_dimension_numbers<[1], [0], [0], [1], [0, 0, 1, 1], [], []>} : vector<4x8xf32>, vector<8x64xf32>, vector<4x64xf32> -> vector<4x64xf32>
    %15 = arith.maximumf %11, %14 : vector<4x64xf32>
    %c0_17 = arith.constant 0 : index
    %c0_18 = arith.constant 0 : index
    %16 = vector.load %arg3[%c0_17, %c0_18] : memref<4x1xf32, #tpu.memory_space<vmem>>, vector<4x1xf32>
    %17 = vector.broadcast %16 : vector<4x1xf32> to vector<4x64xf32>
    %18 = arith.addf %15, %17 : vector<4x64xf32>
    %cst_19 = arith.constant 0.000000e+00 : f32
    %19 = vector.broadcast %cst_19 : f32 to vector<4x64xf32>
    %20 = arith.maximumf %18, %19 : vector<4x64xf32>
    %c0_20 = arith.constant 0 : index
    %c0_21 = arith.constant 0 : index
    %21 = vector.load %arg4[%c0_20, %c0_21] : memref<64x1024xf32, #tpu.memory_space<vmem>>, vector<64x1024xf32>
    %cst_22 = arith.constant dense<0.000000e+00> : vector<4x1024xf32>
    %22 = tpu.matmul %20, %21, %cst_22 {dimension_numbers = #tpu.dot_dimension_numbers<[1], [0], [0], [1], [0, 0, 1, 1], [], []>} : vector<4x64xf32>, vector<64x1024xf32>, vector<4x1024xf32> -> vector<4x1024xf32>
    %c0_23 = arith.constant 0 : index
    %c0_24 = arith.constant 0 : index
    %23 = vector.load %arg5[%c0_23, %c0_24] : memref<1x1024xf32, #tpu.memory_space<vmem>>, vector<1x1024xf32>
    %24 = vector.broadcast %23 : vector<1x1024xf32> to vector<4x1024xf32>
    %25 = arith.addf %22, %24 : vector<4x1024xf32>
    %c0_25 = arith.constant 0 : index
    %c0_26 = arith.constant 0 : index
    %c0_27 = arith.constant 0 : index
    %26 = vector.load %arg8[%c0_25, %c0_26, %c0_27] : memref<1x4x1024xf32, #tpu.memory_space<vmem>>, vector<1x4x1024xf32>
    %27 = vector.shape_cast %26 : vector<1x4x1024xf32> to vector<4x1024xf32>
    %28 = vector.shape_cast %25 : vector<4x1024xf32> to vector<1x4x1024xf32>
    tpu.vector_store %arg8[%c0_25, %c0_26, %c0_27], %28 {strides = array<i32>} : memref<1x4x1024xf32, #tpu.memory_space<vmem>>, vector<1x4x1024xf32>,
    %cst_28 = arith.constant 5.000000e-01 : f32
    %29 = vector.broadcast %cst_28 : f32 to vector<4x1024xf32>
    %30 = arith.mulf %29, %25 : vector<4x1024xf32>
    %31 = arith.mulf %25, %25 : vector<4x1024xf32>
    %32 = arith.mulf %31, %25 : vector<4x1024xf32>
    %cst_29 = arith.constant 4.471500e-02 : f32
    %33 = vector.broadcast %cst_29 : f32 to vector<4x1024xf32>
    %34 = arith.mulf %33, %32 : vector<4x1024xf32>
    %35 = arith.addf %25, %34 : vector<4x1024xf32>
    %cst_30 = arith.constant 0.797884583 : f32
    %36 = vector.broadcast %cst_30 : f32 to vector<4x1024xf32>
    %37 = arith.mulf %36, %35 : vector<4x1024xf32>
    %38 = math.tanh %37 : vector<4x1024xf32>
    %cst_31 = arith.constant 1.000000e+00 : f32
    %39 = vector.broadcast %cst_31 : f32 to vector<4x1024xf32>
    %40 = arith.addf %39, %38 : vector<4x1024xf32>
    %41 = arith.mulf %30, %40 : vector<4x1024xf32>
    %c0_32 = arith.constant 0 : index
    %c0_33 = arith.constant 0 : index
    %42 = vector.load %arg6[%c0_32, %c0_33] : memref<1024x128xf32, #tpu.memory_space<vmem>>, vector<1024x128xf32>
    %cst_34 = arith.constant dense<0.000000e+00> : vector<4x128xf32>
    %43 = tpu.matmul %41, %42, %cst_34 {dimension_numbers = #tpu.dot_dimension_numbers<[1], [0], [0], [1], [0, 0, 1, 1], [], []>} : vector<4x1024xf32>, vector<1024x128xf32>, vector<4x128xf32> -> vector<4x128xf32>
    %c0_35 = arith.constant 0 : index
    %c0_36 = arith.constant 0 : index
    %44 = vector.load %arg7[%c0_35, %c0_36] : memref<1x128xf32, #tpu.memory_space<vmem>>, vector<1x128xf32>
    %45 = vector.broadcast %44 : vector<1x128xf32> to vector<4x128xf32>
    %46 = arith.addf %43, %45 : vector<4x128xf32>
    %c0_37 = arith.constant 0 : index
    %c0_38 = arith.constant 0 : index
    %c0_39 = arith.constant 0 : index
    %47 = vector.load %arg9[%c0_37, %c0_38, %c0_39] : memref<1x4x128xf32, #tpu.memory_space<vmem>>, vector<1x4x128xf32>
    %48 = vector.shape_cast %47 : vector<1x4x128xf32> to vector<4x128xf32>
    %49 = vector.shape_cast %46 : vector<4x128xf32> to vector<1x4x128xf32>
    tpu.vector_store %arg9[%c0_37, %c0_38, %c0_39], %49 {strides = array<i32>} : memref<1x4x128xf32, #tpu.memory_space<vmem>>, vector<1x4x128xf32>,
    return
  }
  func.func @transform_0(%arg0: i32) -> (i32, i32, i32, i32) {
    %c0_i32 = arith.constant 0 : i32
    %c0_i32_0 = arith.constant 0 : i32
    %c0_i32_1 = arith.constant 0 : i32
    %c0_i32_2 = arith.constant 0 : i32
    return %arg0, %c0_i32, %c0_i32_0, %c0_i32_1 : i32, i32, i32, i32
  }
  func.func @transform_1(%arg0: i32) -> (i32, i32) {
    %c0_i32 = arith.constant 0 : i32
    %c0_i32_0 = arith.constant 0 : i32
    %c0_i32_1 = arith.constant 0 : i32
    return %c0_i32, %c0_i32_0 : i32, i32
  }
  func.func @transform_2(%arg0: i32) -> (i32, i32) {
    %c0_i32 = arith.constant 0 : i32
    %c0_i32_0 = arith.constant 0 : i32
    %c0_i32_1 = arith.constant 0 : i32
    return %c0_i32, %c0_i32_0 : i32, i32
  }
  func.func @transform_3(%arg0: i32) -> (i32, i32) {
    %c0_i32 = arith.constant 0 : i32
    %c0_i32_0 = arith.constant 0 : i32
    %c0_i32_1 = arith.constant 0 : i32
    return %c0_i32, %c0_i32_0 : i32, i32
  }
  func.func @transform_4(%arg0: i32) -> (i32, i32) {
    %c0_i32 = arith.constant 0 : i32
    %c0_i32_0 = arith.constant 0 : i32
    %c0_i32_1 = arith.constant 0 : i32
    return %c0_i32, %c0_i32_0 : i32, i32
  }
  func.func @transform_5(%arg0: i32) -> (i32, i32) {
    %c0_i32 = arith.constant 0 : i32
    %c0_i32_0 = arith.constant 0 : i32
    %c0_i32_1 = arith.constant 0 : i32
    return %c0_i32, %c0_i32_0 : i32, i32
  }
  func.func @transform_6(%arg0: i32) -> (i32, i32) {
    %c0_i32 = arith.constant 0 : i32
    %c0_i32_0 = arith.constant 0 : i32
    %c0_i32_1 = arith.constant 0 : i32
    return %c0_i32, %c0_i32_0 : i32, i32
  }
  func.func @transform_7(%arg0: i32) -> (i32, i32, i32) {
    %c0_i32 = arith.constant 0 : i32
    %c0_i32_0 = arith.constant 0 : i32
    %c0_i32_1 = arith.constant 0 : i32
    return %arg0, %c0_i32, %c0_i32_0 : i32, i32, i32
  }
  func.func @transform_8(%arg0: i32) -> (i32, i32, i32) {
    %c0_i32 = arith.constant 0 : i32
    %c0_i32_0 = arith.constant 0 : i32
    %c0_i32_1 = arith.constant 0 : i32
    return %arg0, %c0_i32, %c0_i32_0 : i32, i32, i32
  }
}

module attributes {stable_mosaic.version = 11 : i64} {
  func.func @_pipeline_mlp_kernel(%arg0: i32, %arg1: memref<1x16x8x16xf32, #tpu.memory_space<vmem>>, %arg2: memref<4x8xf32, #tpu.memory_space<vmem>>, %arg3: memref<4x1xf32, #tpu.memory_space<vmem>>, %arg4: memref<16x1024xf32, #tpu.memory_space<vmem>>, %arg5: memref<1x1024xf32, #tpu.memory_space<vmem>>, %arg6: memref<1024x128xf32, #tpu.memory_space<vmem>>, %arg7: memref<1x128xf32, #tpu.memory_space<vmem>>, %arg8: memref<1x4x1024xf32, #tpu.memory_space<vmem>>, %arg9: memref<1x4x128xf32, #tpu.memory_space<vmem>>) attributes {dimension_semantics = [#tpu.dimension_semantics<parallel>], iteration_bounds = array<i64: 2>, scalar_prefetch = 0 : i64, scratch_operands = 0 : i64, tpu.core_type = #tpu.core_type<tc>, window_params = [{transform_indices = @transform_0, window_bounds = array<i64: 1, 16, 8, 16>}, {pipeline_mode = #tpu.pipeline_mode<synchronous>, transform_indices = @transform_1, window_bounds = array<i64: 4, 8>}, {pipeline_mode = #tpu.pipeline_mode<synchronous>, transform_indices = @transform_2, window_bounds = array<i64: 4, 1>}, {pipeline_mode = #tpu.pipeline_mode<synchronous>, transform_indices = @transform_3, window_bounds = array<i64: 16, 1024>}, {pipeline_mode = #tpu.pipeline_mode<synchronous>, transform_indices = @transform_4, window_bounds = array<i64: 1, 1024>}, {pipeline_mode = #tpu.pipeline_mode<synchronous>, transform_indices = @transform_5, window_bounds = array<i64: 1024, 128>}, {pipeline_mode = #tpu.pipeline_mode<synchronous>, transform_indices = @transform_6, window_bounds = array<i64: 1, 128>}, {transform_indices = @transform_7, window_bounds = array<i64: 1, 4, 1024>}, {transform_indices = @transform_8, window_bounds = array<i64: 1, 4, 128>}]} {
    %c0 = arith.constant 0 : index
    %c0_0 = arith.constant 0 : index
    %0 = vector.load %arg2[%c0, %c0_0] : memref<4x8xf32, #tpu.memory_space<vmem>>, vector<4x8xf32>
    %c0_1 = arith.constant 0 : index
    %c0_2 = arith.constant 0 : index
    %c0_3 = arith.constant 0 : index
    %c0_4 = arith.constant 0 : index
    %1 = vector.load %arg1[%c0_1, %c0_2, %c0_3, %c0_4] : memref<1x16x8x16xf32, #tpu.memory_space<vmem>>, vector<1x1x8x16xf32>
    %2 = vector.shape_cast %1 : vector<1x1x8x16xf32> to vector<8x16xf32>
    %cst = arith.constant dense<0.000000e+00> : vector<4x16xf32>
    %3 = tpu.matmul %0, %2, %cst {dimension_numbers = #tpu.dot_dimension_numbers<[1], [0], [0], [1], [0, 0, 1, 1], [], []>} : vector<4x8xf32>, vector<8x16xf32>, vector<4x16xf32> -> vector<4x16xf32>
    %c0_5 = arith.constant 0 : index
    %c1 = arith.constant 1 : index
    %c0_6 = arith.constant 0 : index
    %c0_7 = arith.constant 0 : index
    %4 = vector.load %arg1[%c0_5, %c1, %c0_6, %c0_7] : memref<1x16x8x16xf32, #tpu.memory_space<vmem>>, vector<1x1x8x16xf32>
    %5 = vector.shape_cast %4 : vector<1x1x8x16xf32> to vector<8x16xf32>
    %cst_8 = arith.constant dense<0.000000e+00> : vector<4x16xf32>
    %6 = tpu.matmul %0, %5, %cst_8 {dimension_numbers = #tpu.dot_dimension_numbers<[1], [0], [0], [1], [0, 0, 1, 1], [], []>} : vector<4x8xf32>, vector<8x16xf32>, vector<4x16xf32> -> vector<4x16xf32>
    %7 = arith.maximumf %3, %6 : vector<4x16xf32>
    %c0_9 = arith.constant 0 : index
    %c2 = arith.constant 2 : index
    %c0_10 = arith.constant 0 : index
    %c0_11 = arith.constant 0 : index
    %8 = vector.load %arg1[%c0_9, %c2, %c0_10, %c0_11] : memref<1x16x8x16xf32, #tpu.memory_space<vmem>>, vector<1x1x8x16xf32>
    %9 = vector.shape_cast %8 : vector<1x1x8x16xf32> to vector<8x16xf32>
    %cst_12 = arith.constant dense<0.000000e+00> : vector<4x16xf32>
    %10 = tpu.matmul %0, %9, %cst_12 {dimension_numbers = #tpu.dot_dimension_numbers<[1], [0], [0], [1], [0, 0, 1, 1], [], []>} : vector<4x8xf32>, vector<8x16xf32>, vector<4x16xf32> -> vector<4x16xf32>
    %11 = arith.maximumf %7, %10 : vector<4x16xf32>
    %c0_13 = arith.constant 0 : index
    %c3 = arith.constant 3 : index
    %c0_14 = arith.constant 0 : index
    %c0_15 = arith.constant 0 : index
    %12 = vector.load %arg1[%c0_13, %c3, %c0_14, %c0_15] : memref<1x16x8x16xf32, #tpu.memory_space<vmem>>, vector<1x1x8x16xf32>
    %13 = vector.shape_cast %12 : vector<1x1x8x16xf32> to vector<8x16xf32>
    %cst_16 = arith.constant dense<0.000000e+00> : vector<4x16xf32>
    %14 = tpu.matmul %0, %13, %cst_16 {dimension_numbers = #tpu.dot_dimension_numbers<[1], [0], [0], [1], [0, 0, 1, 1], [], []>} : vector<4x8xf32>, vector<8x16xf32>, vector<4x16xf32> -> vector<4x16xf32>
    %15 = arith.maximumf %11, %14 : vector<4x16xf32>
    %c0_17 = arith.constant 0 : index
    %c4 = arith.constant 4 : index
    %c0_18 = arith.constant 0 : index
    %c0_19 = arith.constant 0 : index
    %16 = vector.load %arg1[%c0_17, %c4, %c0_18, %c0_19] : memref<1x16x8x16xf32, #tpu.memory_space<vmem>>, vector<1x1x8x16xf32>
    %17 = vector.shape_cast %16 : vector<1x1x8x16xf32> to vector<8x16xf32>
    %cst_20 = arith.constant dense<0.000000e+00> : vector<4x16xf32>
    %18 = tpu.matmul %0, %17, %cst_20 {dimension_numbers = #tpu.dot_dimension_numbers<[1], [0], [0], [1], [0, 0, 1, 1], [], []>} : vector<4x8xf32>, vector<8x16xf32>, vector<4x16xf32> -> vector<4x16xf32>
    %19 = arith.maximumf %15, %18 : vector<4x16xf32>
    %c0_21 = arith.constant 0 : index
    %c5 = arith.constant 5 : index
    %c0_22 = arith.constant 0 : index
    %c0_23 = arith.constant 0 : index
    %20 = vector.load %arg1[%c0_21, %c5, %c0_22, %c0_23] : memref<1x16x8x16xf32, #tpu.memory_space<vmem>>, vector<1x1x8x16xf32>
    %21 = vector.shape_cast %20 : vector<1x1x8x16xf32> to vector<8x16xf32>
    %cst_24 = arith.constant dense<0.000000e+00> : vector<4x16xf32>
    %22 = tpu.matmul %0, %21, %cst_24 {dimension_numbers = #tpu.dot_dimension_numbers<[1], [0], [0], [1], [0, 0, 1, 1], [], []>} : vector<4x8xf32>, vector<8x16xf32>, vector<4x16xf32> -> vector<4x16xf32>
    %23 = arith.maximumf %19, %22 : vector<4x16xf32>
    %c0_25 = arith.constant 0 : index
    %c6 = arith.constant 6 : index
    %c0_26 = arith.constant 0 : index
    %c0_27 = arith.constant 0 : index
    %24 = vector.load %arg1[%c0_25, %c6, %c0_26, %c0_27] : memref<1x16x8x16xf32, #tpu.memory_space<vmem>>, vector<1x1x8x16xf32>
    %25 = vector.shape_cast %24 : vector<1x1x8x16xf32> to vector<8x16xf32>
    %cst_28 = arith.constant dense<0.000000e+00> : vector<4x16xf32>
    %26 = tpu.matmul %0, %25, %cst_28 {dimension_numbers = #tpu.dot_dimension_numbers<[1], [0], [0], [1], [0, 0, 1, 1], [], []>} : vector<4x8xf32>, vector<8x16xf32>, vector<4x16xf32> -> vector<4x16xf32>
    %27 = arith.maximumf %23, %26 : vector<4x16xf32>
    %c0_29 = arith.constant 0 : index
    %c7 = arith.constant 7 : index
    %c0_30 = arith.constant 0 : index
    %c0_31 = arith.constant 0 : index
    %28 = vector.load %arg1[%c0_29, %c7, %c0_30, %c0_31] : memref<1x16x8x16xf32, #tpu.memory_space<vmem>>, vector<1x1x8x16xf32>
    %29 = vector.shape_cast %28 : vector<1x1x8x16xf32> to vector<8x16xf32>
    %cst_32 = arith.constant dense<0.000000e+00> : vector<4x16xf32>
    %30 = tpu.matmul %0, %29, %cst_32 {dimension_numbers = #tpu.dot_dimension_numbers<[1], [0], [0], [1], [0, 0, 1, 1], [], []>} : vector<4x8xf32>, vector<8x16xf32>, vector<4x16xf32> -> vector<4x16xf32>
    %31 = arith.maximumf %27, %30 : vector<4x16xf32>
    %c0_33 = arith.constant 0 : index
    %c8 = arith.constant 8 : index
    %c0_34 = arith.constant 0 : index
    %c0_35 = arith.constant 0 : index
    %32 = vector.load %arg1[%c0_33, %c8, %c0_34, %c0_35] : memref<1x16x8x16xf32, #tpu.memory_space<vmem>>, vector<1x1x8x16xf32>
    %33 = vector.shape_cast %32 : vector<1x1x8x16xf32> to vector<8x16xf32>
    %cst_36 = arith.constant dense<0.000000e+00> : vector<4x16xf32>
    %34 = tpu.matmul %0, %33, %cst_36 {dimension_numbers = #tpu.dot_dimension_numbers<[1], [0], [0], [1], [0, 0, 1, 1], [], []>} : vector<4x8xf32>, vector<8x16xf32>, vector<4x16xf32> -> vector<4x16xf32>
    %35 = arith.maximumf %31, %34 : vector<4x16xf32>
    %c0_37 = arith.constant 0 : index
    %c9 = arith.constant 9 : index
    %c0_38 = arith.constant 0 : index
    %c0_39 = arith.constant 0 : index
    %36 = vector.load %arg1[%c0_37, %c9, %c0_38, %c0_39] : memref<1x16x8x16xf32, #tpu.memory_space<vmem>>, vector<1x1x8x16xf32>
    %37 = vector.shape_cast %36 : vector<1x1x8x16xf32> to vector<8x16xf32>
    %cst_40 = arith.constant dense<0.000000e+00> : vector<4x16xf32>
    %38 = tpu.matmul %0, %37, %cst_40 {dimension_numbers = #tpu.dot_dimension_numbers<[1], [0], [0], [1], [0, 0, 1, 1], [], []>} : vector<4x8xf32>, vector<8x16xf32>, vector<4x16xf32> -> vector<4x16xf32>
    %39 = arith.maximumf %35, %38 : vector<4x16xf32>
    %c0_41 = arith.constant 0 : index
    %c10 = arith.constant 10 : index
    %c0_42 = arith.constant 0 : index
    %c0_43 = arith.constant 0 : index
    %40 = vector.load %arg1[%c0_41, %c10, %c0_42, %c0_43] : memref<1x16x8x16xf32, #tpu.memory_space<vmem>>, vector<1x1x8x16xf32>
    %41 = vector.shape_cast %40 : vector<1x1x8x16xf32> to vector<8x16xf32>
    %cst_44 = arith.constant dense<0.000000e+00> : vector<4x16xf32>
    %42 = tpu.matmul %0, %41, %cst_44 {dimension_numbers = #tpu.dot_dimension_numbers<[1], [0], [0], [1], [0, 0, 1, 1], [], []>} : vector<4x8xf32>, vector<8x16xf32>, vector<4x16xf32> -> vector<4x16xf32>
    %43 = arith.maximumf %39, %42 : vector<4x16xf32>
    %c0_45 = arith.constant 0 : index
    %c11 = arith.constant 11 : index
    %c0_46 = arith.constant 0 : index
    %c0_47 = arith.constant 0 : index
    %44 = vector.load %arg1[%c0_45, %c11, %c0_46, %c0_47] : memref<1x16x8x16xf32, #tpu.memory_space<vmem>>, vector<1x1x8x16xf32>
    %45 = vector.shape_cast %44 : vector<1x1x8x16xf32> to vector<8x16xf32>
    %cst_48 = arith.constant dense<0.000000e+00> : vector<4x16xf32>
    %46 = tpu.matmul %0, %45, %cst_48 {dimension_numbers = #tpu.dot_dimension_numbers<[1], [0], [0], [1], [0, 0, 1, 1], [], []>} : vector<4x8xf32>, vector<8x16xf32>, vector<4x16xf32> -> vector<4x16xf32>
    %47 = arith.maximumf %43, %46 : vector<4x16xf32>
    %c0_49 = arith.constant 0 : index
    %c12 = arith.constant 12 : index
    %c0_50 = arith.constant 0 : index
    %c0_51 = arith.constant 0 : index
    %48 = vector.load %arg1[%c0_49, %c12, %c0_50, %c0_51] : memref<1x16x8x16xf32, #tpu.memory_space<vmem>>, vector<1x1x8x16xf32>
    %49 = vector.shape_cast %48 : vector<1x1x8x16xf32> to vector<8x16xf32>
    %cst_52 = arith.constant dense<0.000000e+00> : vector<4x16xf32>
    %50 = tpu.matmul %0, %49, %cst_52 {dimension_numbers = #tpu.dot_dimension_numbers<[1], [0], [0], [1], [0, 0, 1, 1], [], []>} : vector<4x8xf32>, vector<8x16xf32>, vector<4x16xf32> -> vector<4x16xf32>
    %51 = arith.maximumf %47, %50 : vector<4x16xf32>
    %c0_53 = arith.constant 0 : index
    %c13 = arith.constant 13 : index
    %c0_54 = arith.constant 0 : index
    %c0_55 = arith.constant 0 : index
    %52 = vector.load %arg1[%c0_53, %c13, %c0_54, %c0_55] : memref<1x16x8x16xf32, #tpu.memory_space<vmem>>, vector<1x1x8x16xf32>
    %53 = vector.shape_cast %52 : vector<1x1x8x16xf32> to vector<8x16xf32>
    %cst_56 = arith.constant dense<0.000000e+00> : vector<4x16xf32>
    %54 = tpu.matmul %0, %53, %cst_56 {dimension_numbers = #tpu.dot_dimension_numbers<[1], [0], [0], [1], [0, 0, 1, 1], [], []>} : vector<4x8xf32>, vector<8x16xf32>, vector<4x16xf32> -> vector<4x16xf32>
    %55 = arith.maximumf %51, %54 : vector<4x16xf32>
    %c0_57 = arith.constant 0 : index
    %c14 = arith.constant 14 : index
    %c0_58 = arith.constant 0 : index
    %c0_59 = arith.constant 0 : index
    %56 = vector.load %arg1[%c0_57, %c14, %c0_58, %c0_59] : memref<1x16x8x16xf32, #tpu.memory_space<vmem>>, vector<1x1x8x16xf32>
    %57 = vector.shape_cast %56 : vector<1x1x8x16xf32> to vector<8x16xf32>
    %cst_60 = arith.constant dense<0.000000e+00> : vector<4x16xf32>
    %58 = tpu.matmul %0, %57, %cst_60 {dimension_numbers = #tpu.dot_dimension_numbers<[1], [0], [0], [1], [0, 0, 1, 1], [], []>} : vector<4x8xf32>, vector<8x16xf32>, vector<4x16xf32> -> vector<4x16xf32>
    %59 = arith.maximumf %55, %58 : vector<4x16xf32>
    %c0_61 = arith.constant 0 : index
    %c15 = arith.constant 15 : index
    %c0_62 = arith.constant 0 : index
    %c0_63 = arith.constant 0 : index
    %60 = vector.load %arg1[%c0_61, %c15, %c0_62, %c0_63] : memref<1x16x8x16xf32, #tpu.memory_space<vmem>>, vector<1x1x8x16xf32>
    %61 = vector.shape_cast %60 : vector<1x1x8x16xf32> to vector<8x16xf32>
    %cst_64 = arith.constant dense<0.000000e+00> : vector<4x16xf32>
    %62 = tpu.matmul %0, %61, %cst_64 {dimension_numbers = #tpu.dot_dimension_numbers<[1], [0], [0], [1], [0, 0, 1, 1], [], []>} : vector<4x8xf32>, vector<8x16xf32>, vector<4x16xf32> -> vector<4x16xf32>
    %63 = arith.maximumf %59, %62 : vector<4x16xf32>
    %c0_65 = arith.constant 0 : index
    %c0_66 = arith.constant 0 : index
    %64 = vector.load %arg3[%c0_65, %c0_66] : memref<4x1xf32, #tpu.memory_space<vmem>>, vector<4x1xf32>
    %65 = vector.broadcast %64 : vector<4x1xf32> to vector<4x16xf32>
    %66 = arith.addf %63, %65 : vector<4x16xf32>
    %cst_67 = arith.constant 0.000000e+00 : f32
    %67 = vector.broadcast %cst_67 : f32 to vector<4x16xf32>
    %68 = arith.maximumf %66, %67 : vector<4x16xf32>
    %c0_68 = arith.constant 0 : index
    %c0_69 = arith.constant 0 : index
    %69 = vector.load %arg4[%c0_68, %c0_69] : memref<16x1024xf32, #tpu.memory_space<vmem>>, vector<16x1024xf32>
    %cst_70 = arith.constant dense<0.000000e+00> : vector<4x1024xf32>
    %70 = tpu.matmul %68, %69, %cst_70 {dimension_numbers = #tpu.dot_dimension_numbers<[1], [0], [0], [1], [0, 0, 1, 1], [], []>} : vector<4x16xf32>, vector<16x1024xf32>, vector<4x1024xf32> -> vector<4x1024xf32>
    %c0_71 = arith.constant 0 : index
    %c0_72 = arith.constant 0 : index
    %71 = vector.load %arg5[%c0_71, %c0_72] : memref<1x1024xf32, #tpu.memory_space<vmem>>, vector<1x1024xf32>
    %72 = vector.broadcast %71 : vector<1x1024xf32> to vector<4x1024xf32>
    %73 = arith.addf %70, %72 : vector<4x1024xf32>
    %c0_73 = arith.constant 0 : index
    %c0_74 = arith.constant 0 : index
    %c0_75 = arith.constant 0 : index
    %74 = vector.load %arg8[%c0_73, %c0_74, %c0_75] : memref<1x4x1024xf32, #tpu.memory_space<vmem>>, vector<1x4x1024xf32>
    %75 = vector.shape_cast %74 : vector<1x4x1024xf32> to vector<4x1024xf32>
    %76 = vector.shape_cast %73 : vector<4x1024xf32> to vector<1x4x1024xf32>
    tpu.vector_store %arg8[%c0_73, %c0_74, %c0_75], %76 {strides = array<i32>} : memref<1x4x1024xf32, #tpu.memory_space<vmem>>, vector<1x4x1024xf32>,
    %cst_76 = arith.constant 5.000000e-01 : f32
    %77 = vector.broadcast %cst_76 : f32 to vector<4x1024xf32>
    %78 = arith.mulf %77, %73 : vector<4x1024xf32>
    %79 = arith.mulf %73, %73 : vector<4x1024xf32>
    %80 = arith.mulf %79, %73 : vector<4x1024xf32>
    %cst_77 = arith.constant 4.471500e-02 : f32
    %81 = vector.broadcast %cst_77 : f32 to vector<4x1024xf32>
    %82 = arith.mulf %81, %80 : vector<4x1024xf32>
    %83 = arith.addf %73, %82 : vector<4x1024xf32>
    %cst_78 = arith.constant 0.797884583 : f32
    %84 = vector.broadcast %cst_78 : f32 to vector<4x1024xf32>
    %85 = arith.mulf %84, %83 : vector<4x1024xf32>
    %86 = math.tanh %85 : vector<4x1024xf32>
    %cst_79 = arith.constant 1.000000e+00 : f32
    %87 = vector.broadcast %cst_79 : f32 to vector<4x1024xf32>
    %88 = arith.addf %87, %86 : vector<4x1024xf32>
    %89 = arith.mulf %78, %88 : vector<4x1024xf32>
    %c0_80 = arith.constant 0 : index
    %c0_81 = arith.constant 0 : index
    %90 = vector.load %arg6[%c0_80, %c0_81] : memref<1024x128xf32, #tpu.memory_space<vmem>>, vector<1024x128xf32>
    %cst_82 = arith.constant dense<0.000000e+00> : vector<4x128xf32>
    %91 = tpu.matmul %89, %90, %cst_82 {dimension_numbers = #tpu.dot_dimension_numbers<[1], [0], [0], [1], [0, 0, 1, 1], [], []>} : vector<4x1024xf32>, vector<1024x128xf32>, vector<4x128xf32> -> vector<4x128xf32>
    %c0_83 = arith.constant 0 : index
    %c0_84 = arith.constant 0 : index
    %92 = vector.load %arg7[%c0_83, %c0_84] : memref<1x128xf32, #tpu.memory_space<vmem>>, vector<1x128xf32>
    %93 = vector.broadcast %92 : vector<1x128xf32> to vector<4x128xf32>
    %94 = arith.addf %91, %93 : vector<4x128xf32>
    %c0_85 = arith.constant 0 : index
    %c0_86 = arith.constant 0 : index
    %c0_87 = arith.constant 0 : index
    %95 = vector.load %arg9[%c0_85, %c0_86, %c0_87] : memref<1x4x128xf32, #tpu.memory_space<vmem>>, vector<1x4x128xf32>
    %96 = vector.shape_cast %95 : vector<1x4x128xf32> to vector<4x128xf32>
    %97 = vector.shape_cast %94 : vector<4x128xf32> to vector<1x4x128xf32>
    tpu.vector_store %arg9[%c0_85, %c0_86, %c0_87], %97 {strides = array<i32>} : memref<1x4x128xf32, #tpu.memory_space<vmem>>, vector<1x4x128xf32>,
    return
  }
  func.func @transform_0(%arg0: i32) -> (i32, i32, i32, i32) {
    %c0_i32 = arith.constant 0 : i32
    %c0_i32_0 = arith.constant 0 : i32
    %c0_i32_1 = arith.constant 0 : i32
    %c0_i32_2 = arith.constant 0 : i32
    return %arg0, %c0_i32, %c0_i32_0, %c0_i32_1 : i32, i32, i32, i32
  }
  func.func @transform_1(%arg0: i32) -> (i32, i32) {
    %c0_i32 = arith.constant 0 : i32
    %c0_i32_0 = arith.constant 0 : i32
    %c0_i32_1 = arith.constant 0 : i32
    return %c0_i32, %c0_i32_0 : i32, i32
  }
  func.func @transform_2(%arg0: i32) -> (i32, i32) {
    %c0_i32 = arith.constant 0 : i32
    %c0_i32_0 = arith.constant 0 : i32
    %c0_i32_1 = arith.constant 0 : i32
    return %c0_i32, %c0_i32_0 : i32, i32
  }
  func.func @transform_3(%arg0: i32) -> (i32, i32) {
    %c0_i32 = arith.constant 0 : i32
    %c0_i32_0 = arith.constant 0 : i32
    %c0_i32_1 = arith.constant 0 : i32
    return %c0_i32, %c0_i32_0 : i32, i32
  }
  func.func @transform_4(%arg0: i32) -> (i32, i32) {
    %c0_i32 = arith.constant 0 : i32
    %c0_i32_0 = arith.constant 0 : i32
    %c0_i32_1 = arith.constant 0 : i32
    return %c0_i32, %c0_i32_0 : i32, i32
  }
  func.func @transform_5(%arg0: i32) -> (i32, i32) {
    %c0_i32 = arith.constant 0 : i32
    %c0_i32_0 = arith.constant 0 : i32
    %c0_i32_1 = arith.constant 0 : i32
    return %c0_i32, %c0_i32_0 : i32, i32
  }
  func.func @transform_6(%arg0: i32) -> (i32, i32) {
    %c0_i32 = arith.constant 0 : i32
    %c0_i32_0 = arith.constant 0 : i32
    %c0_i32_1 = arith.constant 0 : i32
    return %c0_i32, %c0_i32_0 : i32, i32
  }
  func.func @transform_7(%arg0: i32) -> (i32, i32, i32) {
    %c0_i32 = arith.constant 0 : i32
    %c0_i32_0 = arith.constant 0 : i32
    %c0_i32_1 = arith.constant 0 : i32
    return %arg0, %c0_i32, %c0_i32_0 : i32, i32, i32
  }
  func.func @transform_8(%arg0: i32) -> (i32, i32, i32) {
    %c0_i32 = arith.constant 0 : i32
    %c0_i32_0 = arith.constant 0 : i32
    %c0_i32_1 = arith.constant 0 : i32
    return %arg0, %c0_i32, %c0_i32_0 : i32, i32, i32
  }
}

</mosaic_0001>

<bundles_post_ra>
// kernel: _lambda_.2
= control target key start
LH: loop header
LB: loop body
LE: loop exit
PB: predicated region body
PF: predicated region fallthrough
CT: control target
= control target key end

     0   :  { %s1252_s27 = smov 0   ;;  %s1948_s0 = inlined_call_operand.vmem [shape: f32[2,4,8,64], index: 0, kind: input, shape index: {}]   ;;  %s1949_s1 = inlined_call_operand.vmem [shape: f32[4,8], index: 1, kind: input, shape index: {}]   ;;  %s1950_s2 = inlined_call_operand.vmem [shape: f32[4,1], index: 2, kind: input, shape index: {}]   ;;  %s1951_s3 = inlined_call_operand.vmem [shape: f32[64,1024], index: 3, kind: input, shape index: {}]   ;;  %s1952_s4 = inlined_call_operand.vmem [shape: f32[1,1024], index: 4, kind: input, shape index: {}]   ;;  %s1953_s5 = inlined_call_operand.vmem [shape: f32[1024,128], index: 5, kind: input, shape index: {}]   ;;  %s1954_s6 = inlined_call_operand.vmem [shape: f32[1,128], index: 6, kind: input, shape index: {}]   ;;  %s1955_s7 = inlined_call_operand.vmem [shape: f32[2,4,1024], index: 7, kind: output, shape index: {0}]   ;;  %s1956_s8 = inlined_call_operand.vmem [shape: f32[2,4,128], index: 8, kind: output, shape index: {1}]  }
   0x1 LB: > { %s1142_s28 = sadd.s32 4294967295, %s1204_s27   ;;  %p1146_p0 = scmp.ge.s32.totalorder %s1204_s27, 1  ;;  %s1204_s27 = sphi %s1252_s27, %s19_s27  }
   0x2   : > { %p265_p1 = scmp.lt.s32.totalorder %s1204_s27, 3 }
   0x4   : > { %p266_p2 = pnand %p1146_p0, %p265_p1 }
   0x5   : > { %p303_p3 = scmp.lt.s32.totalorder (!%p266_p2), %s1142_s28, 1 }
   0x6   : > { %269 = sbr.rel (%p266_p2) target bundleno = 458 (0x1ca), region = 48 }
   0xb   : > { %v1206_v0 = vmov 0   ;;  %v412_v1 = vld [vmem:[%s1950_s2] sm:$0xf]  ;;  %s1958_s28 = smov (!%p303_p3, %s1142_s28), 1  ;;  %vm319_vm0 = vcmask 64512   ;;  %v477_v8 = vld [vmem:[%s1951_s3 + $0x1c8] sm:$0xff] }
   0xc   : > { %1180 = vset.pattern.permute.xlu0 %v1206_v0  ;;  %s1169_s9 = sshll.u32 %s1958_s28, 5  ;;  %v317_v2 = vld [vmem:[%s1949_s1] sm:$0xf]  ;;  %v478_v9 = vld [vmem:[%s1951_s3 + $0x1d0] sm:$0xff]  ;;  %v479_v10 = vld [vmem:[%s1951_s3 + $0x1d8] sm:$0xff]  ;;  %vm502_vm1 = vcmask 523264  }
   0xd   : > { %415 = vperm.xlu0 %1180, %v412_v1   ;;  %s307_s12 = scalar_lea.vmem %s1948_s0, %s1169_s9  ;;  %v476_v7 = vld [vmem:[%s1951_s3 + $0x1c0] sm:$0xff]  ;;  %v469_v12 = vld [vmem:[%s1951_s3 + $0x188] sm:$0xff]  ;;  %v470_v13 = vld [vmem:[%s1951_s3 + $0x190] sm:$0xff]  ;;  %vm678_vm2 = vcmask 1043456   ;;  %s1860_s11 = scalar_lea.vmem %s1955_s7, %s1169_s9 }
   0xe   : > { %v1155_v3 = vld [vmem:[%s307_s12 + $0x10] sm:$0xff]  ;;  %v1157_v4 = vld [vmem:[%s307_s12 + $0x18] sm:$0xff]  ;;  %v318_v5 = vld [vmem:[%s307_s12] sm:$0xff]  ;;  %s1151_s25 = sshll.u32 %s1958_s28, 2 }
   0xf   : > { %383 = vmatpush.msra.mxu2 %v1155_v3  ;;  %406 = vmatpush.msra.mxu3 %v1157_v4  ;;  %v1153_v6 = vld [vmem:[%s307_s12 + $0x8] sm:$0xff]  ;;  %v468_v11 = vld [vmem:[%s1951_s3 + $0x180] sm:$0xff]  ;;  %v471_v14 = vld [vmem:[%s1951_s3 + $0x198] sm:$0xff]  ;;  %s316_s30 = scalar_lea.vmem %s1956_s8, %s1151_s25 }
  0x10   : > { %1156 = vmatmul.msk.f32.vlgmr.msra.gmra.mxu2 %vm319_vm0, %v317_v2  ;;  %1158 = vmatmul.msk.f32.vlgmr.msra.gmra.mxu3 %vm319_vm0, %v317_v2  ;;  %v460_v15 = vld [vmem:[%s1951_s3 + $0x140] sm:$0xff]  ;;  %v461_v16 = vld [vmem:[%s1951_s3 + $0x148] sm:$0xff]  ;;  %v462_v17 = vld [vmem:[%s1951_s3 + $0x150] sm:$0xff] }
  0x11   : > { %338 = vmatpush.msra.mxu0 %v318_v5  ;;  %360 = vmatpush.msra.mxu1 %v1153_v6  ;;  %v463_v18 = vld [vmem:[%s1951_s3 + $0x158] sm:$0xff]  ;;  %v452_v19 = vld [vmem:[%s1951_s3 + $0x100] sm:$0xff]  ;;  %v453_v20 = vld [vmem:[%s1951_s3 + $0x108] sm:$0xff] }
  0x12   : > { %1152 = vmatmul.msk.f32.vlgmr.msra.gmra.mxu0 %vm319_vm0, %v317_v2  ;;  %1154 = vmatmul.msk.f32.vlgmr.msra.gmra.mxu1 %vm319_vm0, %v317_v2  ;;  %v454_v21 = vld [vmem:[%s1951_s3 + $0x110] sm:$0xff]  ;;  %v455_v22 = vld [vmem:[%s1951_s3 + $0x118] sm:$0xff]  ;;  %v444_v23 = vld [vmem:[%s1951_s3 + $0xc0] sm:$0xff] }
  0x13   : > { %514 = vmatpush.msrb.mxu0 %v476_v7  ;;  %534 = vmatpush.msrb.mxu1 %v477_v8  ;;  %v445_v24 = vld [vmem:[%s1951_s3 + $0xc8] sm:$0xff]  ;;  %v446_v25 = vld [vmem:[%s1951_s3 + $0xd0] sm:$0xff]  ;;  %v447_v26 = vld [vmem:[%s1951_s3 + $0xd8] sm:$0xff] }
  0x14   : > { %554 = vmatpush.msrb.mxu2 %v478_v9  ;;  %574 = vmatpush.msrb.mxu3 %v479_v10  ;;  %v436_v27 = vld [vmem:[%s1951_s3 + $0x80] sm:$0xff]  ;;  %v437_v28 = vld [vmem:[%s1951_s3 + $0x88] sm:$0xff]  ;;  %v438_v29 = vld [vmem:[%s1951_s3 + $0x90] sm:$0xff] }
  0x15   : > { %515 = vmatpush.msrb.mxu0 %v468_v11  ;;  %535 = vmatpush.msrb.mxu1 %v469_v12  ;;  %v439_v30 = vld [vmem:[%s1951_s3 + $0x98] sm:$0xff]  ;;  %v428_v31 = vld [vmem:[%s1951_s3 + $0x40] sm:$0xff]  ;;  %v429_v32 = vld [vmem:[%s1951_s3 + $0x48] sm:$0xff] }
  0x16   : > { %555 = vmatpush.msrb.mxu2 %v470_v13  ;;  %575 = vmatpush.msrb.mxu3 %v471_v14  ;;  %v430_v33 = vld [vmem:[%s1951_s3 + $0x50] sm:$0xff]  ;;  %v431_v34 = vld [vmem:[%s1951_s3 + $0x58] sm:$0xff]  ;;  %v420_v35 = vld [vmem:[%s1951_s3] sm:$0xff] }
  0x17   : > { %516 = vmatpush.msrb.mxu0 %v460_v15  ;;  %536 = vmatpush.msrb.mxu1 %v461_v16  ;;  %v421_v36 = vld [vmem:[%s1951_s3 + $0x8] sm:$0xff]  ;;  %v422_v37 = vld [vmem:[%s1951_s3 + $0x10] sm:$0xff]  ;;  %v423_v38 = vld [vmem:[%s1951_s3 + $0x18] sm:$0xff] }
  0x18   : > { %556 = vmatpush.msrb.mxu2 %v462_v17  ;;  %576 = vmatpush.msrb.mxu3 %v463_v18  ;;  %v480_v39 = vld [vmem:[%s1951_s3 + $0x1e0] sm:$0xff]  ;;  %v481_v40 = vld [vmem:[%s1951_s3 + $0x1e8] sm:$0xff]  ;;  %v482_v41 = vld [vmem:[%s1951_s3 + $0x1f0] sm:$0xff] }
  0x19   : > { %517 = vmatpush.msrb.mxu0 %v452_v19  ;;  %537 = vmatpush.msrb.mxu1 %v453_v20  ;;  %v483_v42 = vld [vmem:[%s1951_s3 + $0x1f8] sm:$0xff]  ;;  %v472_v43 = vld [vmem:[%s1951_s3 + $0x1a0] sm:$0xff]  ;;  %v473_v44 = vld [vmem:[%s1951_s3 + $0x1a8] sm:$0xff] }
  0x1a   : > { %557 = vmatpush.msrb.mxu2 %v454_v21  ;;  %577 = vmatpush.msrb.mxu3 %v455_v22  ;;  %v474_v45 = vld [vmem:[%s1951_s3 + $0x1b0] sm:$0xff]  ;;  %v475_v46 = vld [vmem:[%s1951_s3 + $0x1b8] sm:$0xff]  ;;  %v464_v47 = vld [vmem:[%s1951_s3 + $0x160] sm:$0xff] }
  0x1b   : > { %518 = vmatpush.msrb.mxu0 %v444_v23  ;;  %538 = vmatpush.msrb.mxu1 %v445_v24  ;;  %v465_v48 = vld [vmem:[%s1951_s3 + $0x168] sm:$0xff]  ;;  %v466_v49 = vld [vmem:[%s1951_s3 + $0x170] sm:$0xff]  ;;  %v467_v50 = vld [vmem:[%s1951_s3 + $0x178] sm:$0xff] }
  0x1c   : > { %558 = vmatpush.msrb.mxu2 %v446_v25  ;;  %578 = vmatpush.msrb.mxu3 %v447_v26  ;;  %v456_v51 = vld [vmem:[%s1951_s3 + $0x120] sm:$0xff]  ;;  %v457_v52 = vld [vmem:[%s1951_s3 + $0x128] sm:$0xff]  ;;  %v458_v53 = vld [vmem:[%s1951_s3 + $0x130] sm:$0xff] }
  0x1d   : > { %519 = vmatpush.msrb.mxu0 %v436_v27  ;;  %539 = vmatpush.msrb.mxu1 %v437_v28  ;;  %v459_v54 = vld [vmem:[%s1951_s3 + $0x138] sm:$0xff]  ;;  %v448_v55 = vld [vmem:[%s1951_s3 + $0xe0] sm:$0xff]  ;;  %v449_v56 = vld [vmem:[%s1951_s3 + $0xe8] sm:$0xff] }
  0x1e   : > { %559 = vmatpush.msrb.mxu2 %v438_v29  ;;  %579 = vmatpush.msrb.mxu3 %v439_v30  ;;  %v450_v57 = vld [vmem:[%s1951_s3 + $0xf0] sm:$0xff]  ;;  %v451_v58 = vld [vmem:[%s1951_s3 + $0xf8] sm:$0xff]  ;;  %v440_v59 = vld [vmem:[%s1951_s3 + $0xa0] sm:$0xff] }
  0x1f   : > { %520 = vmatpush.msrb.mxu0 %v428_v31  ;;  %540 = vmatpush.msrb.mxu1 %v429_v32  ;;  %v441_v60 = vld [vmem:[%s1951_s3 + $0xa8] sm:$0xff]  ;;  %v442_v61 = vld [vmem:[%s1951_s3 + $0xb0] sm:$0xff]  ;;  %v443_v62 = vld [vmem:[%s1951_s3 + $0xb8] sm:$0xff] }
  0x20   : > { %560 = vmatpush.msrb.mxu2 %v430_v33  ;;  %580 = vmatpush.msrb.mxu3 %v431_v34  ;;  %v432_v63 = vld [vmem:[%s1951_s3 + $0x60] sm:$0xff]  ;;  %v433_v0 = vld [vmem:[%s1951_s3 + $0x68] sm:$0xff]  ;;  %v434_v1 = vld [vmem:[%s1951_s3 + $0x70] sm:$0xff] }
  0x21   : > { %521 = vmatpush.msrb.mxu0 %v420_v35  ;;  %541 = vmatpush.msrb.mxu1 %v421_v36  ;;  %v435_v2 = vld [vmem:[%s1951_s3 + $0x78] sm:$0xff]  ;;  %v424_v3 = vld [vmem:[%s1951_s3 + $0x20] sm:$0xff]  ;;  %v425_v4 = vld [vmem:[%s1951_s3 + $0x28] sm:$0xff] }
  0x22   : > { %561 = vmatpush.msrb.mxu2 %v422_v37  ;;  %581 = vmatpush.msrb.mxu3 %v423_v38  ;;  %v426_v5 = vld [vmem:[%s1951_s3 + $0x30] sm:$0xff]  ;;  %v427_v6 = vld [vmem:[%s1951_s3 + $0x38] sm:$0xff]  ;;  %v776_v25 = vld [vmem:[%s1953_s5 + $0x68] sm:$0xff] }
  0x23   : > { %594 = vmatpush.msra.mxu0 %v480_v39  ;;  %614 = vmatpush.msra.mxu1 %v481_v40  ;;  %v778_v17 = vld [vmem:[%s1953_s5 + $0x78] sm:$0xff]  ;;  %v777_v21 = vld [vmem:[%s1953_s5 + $0x70] sm:$0xff]  ;;  %v792_v26 = vld [vmem:[%s1953_s5 + $0xe8] sm:$0xff] }
  0x24   : > { %634 = vmatpush.msra.mxu2 %v482_v41  ;;  %654 = vmatpush.msra.mxu3 %v483_v42  ;;  %v794_v18 = vld [vmem:[%s1953_s5 + $0xf8] sm:$0xff]  ;;  %v793_v22 = vld [vmem:[%s1953_s5 + $0xf0] sm:$0xff]  ;;  %v808_v27 = vld [vmem:[%s1953_s5 + $0x168] sm:$0xff] }
  0x25   : > { %595 = vmatpush.msra.mxu0 %v472_v43  ;;  %615 = vmatpush.msra.mxu1 %v473_v44  ;;  %v810_v19 = vld [vmem:[%s1953_s5 + $0x178] sm:$0xff]  ;;  %v809_v23 = vld [vmem:[%s1953_s5 + $0x170] sm:$0xff]  ;;  %v824_v28 = vld [vmem:[%s1953_s5 + $0x1e8] sm:$0xff] }
  0x26   : > { %635 = vmatpush.msra.mxu2 %v474_v45  ;;  %655 = vmatpush.msra.mxu3 %v475_v46  ;;  %v826_v20 = vld [vmem:[%s1953_s5 + $0x1f8] sm:$0xff]  ;;  %v825_v24 = vld [vmem:[%s1953_s5 + $0x1f0] sm:$0xff]  ;;  %v775_v29 = vld [vmem:[%s1953_s5 + $0x60] sm:$0xff] }
  0x27   : > { %596 = vmatpush.msra.mxu0 %v464_v47  ;;  %616 = vmatpush.msra.mxu1 %v465_v48  ;;  %v791_v30 = vld [vmem:[%s1953_s5 + $0xe0] sm:$0xff]  ;;  %v774_v33 = vld [vmem:[%s1953_s5 + $0x58] sm:$0xff]  ;;  %v773_v37 = vld [vmem:[%s1953_s5 + $0x50] sm:$0xff] }
  0x28   : > { %636 = vmatpush.msra.mxu2 %v466_v49  ;;  %656 = vmatpush.msra.mxu3 %v467_v50  ;;  %v807_v31 = vld [vmem:[%s1953_s5 + $0x160] sm:$0xff]  ;;  %v790_v34 = vld [vmem:[%s1953_s5 + $0xd8] sm:$0xff]  ;;  %v789_v38 = vld [vmem:[%s1953_s5 + $0xd0] sm:$0xff] }
  0x29   : > { %597 = vmatpush.msra.mxu0 %v456_v51  ;;  %617 = vmatpush.msra.mxu1 %v457_v52  ;;  %v823_v32 = vld [vmem:[%s1953_s5 + $0x1e0] sm:$0xff]  ;;  %v806_v35 = vld [vmem:[%s1953_s5 + $0x158] sm:$0xff]  ;;  %v805_v39 = vld [vmem:[%s1953_s5 + $0x150] sm:$0xff] }
  0x2a   : > { %637 = vmatpush.msra.mxu2 %v458_v53  ;;  %657 = vmatpush.msra.mxu3 %v459_v54  ;;  %v822_v36 = vld [vmem:[%s1953_s5 + $0x1d8] sm:$0xff]  ;;  %v821_v40 = vld [vmem:[%s1953_s5 + $0x1d0] sm:$0xff]  ;;  %v772_v41 = vld [vmem:[%s1953_s5 + $0x48] sm:$0xff] }
  0x2b   : > { %598 = vmatpush.msra.mxu0 %v448_v55  ;;  %618 = vmatpush.msra.mxu1 %v449_v56  ;;  %v788_v42 = vld [vmem:[%s1953_s5 + $0xc8] sm:$0xff]  ;;  %v771_v45 = vld [vmem:[%s1953_s5 + $0x40] sm:$0xff]  ;;  %v770_v49 = vld [vmem:[%s1953_s5 + $0x38] sm:$0xff] }
  0x2c   : > { %638 = vmatpush.msra.mxu2 %v450_v57  ;;  %658 = vmatpush.msra.mxu3 %v451_v58  ;;  %v804_v43 = vld [vmem:[%s1953_s5 + $0x148] sm:$0xff]  ;;  %v787_v46 = vld [vmem:[%s1953_s5 + $0xc0] sm:$0xff]  ;;  %v786_v50 = vld [vmem:[%s1953_s5 + $0xb8] sm:$0xff] }
  0x2d   : > { %599 = vmatpush.msra.mxu0 %v440_v59  ;;  %619 = vmatpush.msra.mxu1 %v441_v60  ;;  %v820_v44 = vld [vmem:[%s1953_s5 + $0x1c8] sm:$0xff]  ;;  %v803_v47 = vld [vmem:[%s1953_s5 + $0x140] sm:$0xff]  ;;  %v802_v51 = vld [vmem:[%s1953_s5 + $0x138] sm:$0xff] }
  0x2e   : > { %639 = vmatpush.msra.mxu2 %v442_v61  ;;  %659 = vmatpush.msra.mxu3 %v443_v62  ;;  %v819_v48 = vld [vmem:[%s1953_s5 + $0x1c0] sm:$0xff]  ;;  %v818_v52 = vld [vmem:[%s1953_s5 + $0x1b8] sm:$0xff]  ;;  %v769_v53 = vld [vmem:[%s1953_s5 + $0x30] sm:$0xff] }
  0x2f   : > { %600 = vmatpush.msra.mxu0 %v432_v63  ;;  %620 = vmatpush.msra.mxu1 %v433_v0  ;;  %v785_v54 = vld [vmem:[%s1953_s5 + $0xb0] sm:$0xff]  ;;  %v768_v57 = vld [vmem:[%s1953_s5 + $0x28] sm:$0xff]  ;;  %v767_v61 = vld [vmem:[%s1953_s5 + $0x20] sm:$0xff] }
  0x30   : > { %640 = vmatpush.msra.mxu2 %v434_v1  ;;  %660 = vmatpush.msra.mxu3 %v435_v2  ;;  %v801_v55 = vld [vmem:[%s1953_s5 + $0x130] sm:$0xff]  ;;  %v784_v58 = vld [vmem:[%s1953_s5 + $0xa8] sm:$0xff]  ;;  %v783_v62 = vld [vmem:[%s1953_s5 + $0xa0] sm:$0xff] }
  0x31   : > { %601 = vmatpush.msra.mxu0 %v424_v3  ;;  %621 = vmatpush.msra.mxu1 %v425_v4  ;;  %v817_v56 = vld [vmem:[%s1953_s5 + $0x1b0] sm:$0xff]  ;;  %v800_v59 = vld [vmem:[%s1953_s5 + $0x128] sm:$0xff]  ;;  %v799_v63 = vld [vmem:[%s1953_s5 + $0x120] sm:$0xff] }
  0x32   : > { %641 = vmatpush.msra.mxu2 %v426_v5  ;;  %661 = vmatpush.msra.mxu3 %v427_v6  ;;  %v816_v60 = vld [vmem:[%s1953_s5 + $0x1a8] sm:$0xff]  ;;  %v815_v0 = vld [vmem:[%s1953_s5 + $0x1a0] sm:$0xff]  ;;  %v766_v1 = vld [vmem:[%s1953_s5 + $0x18] sm:$0xff] }
  0x33   : > { %v782_v2 = vld [vmem:[%s1953_s5 + $0x98] sm:$0xff]  ;;  %v765_v3 = vld [vmem:[%s1953_s5 + $0x10] sm:$0xff]  ;;  %v764_v5 = vld [vmem:[%s1953_s5 + $0x8] sm:$0xff] }
  0x34   : > { %v781_v4 = vld [vmem:[%s1953_s5 + $0x90] sm:$0xff]  ;;  %v780_v6 = vld [vmem:[%s1953_s5 + $0x88] sm:$0xff] }
  0x7f   : > { %v416_v13 = vpop.permute.xlu0 %415 }
  0x8f   : > { %v340_v7 = vpop.f32.mrf.mxu0  ;;  %v362_v8 = vpop.f32.mrf.mxu1 }
  0x90   : > { %v365_v9 = vmax.f32 %v340_v7, %v362_v8  ;;  %v763_v7 = vld [vmem:[%s1953_s5] sm:$0xff] }
  0x91   : > { %v779_v8 = vld [vmem:[%s1953_s5 + $0x80] sm:$0xff] }
  0x93   : > { %v385_v10 = vpop.f32.mrf.mxu2  ;;  %v408_v11 = vpop.f32.mrf.mxu3 }
  0x94   : > { %v388_v12 = vmax.f32 %v365_v9, %v385_v10  ;;  %v798_v9 = vld [vmem:[%s1953_s5 + $0x118] sm:$0xff] }
  0x95   : > { %v814_v10 = vld [vmem:[%s1953_s5 + $0x198] sm:$0xff] }
  0x96   : > { %v411_v14 = vmax.f32 %v388_v12, %v408_v11  ;;  %v842_v11 = vld [vmem:[%s1953_s5 + $0x278] sm:$0xff] }
  0x97   : > { %v858_v12 = vld [vmem:[%s1953_s5 + $0x2f8] sm:$0xff] }
  0x98   : > { %v418_v15 = vadd.f32 %v416_v13, %v411_v14  ;;  %v797_v13 = vld [vmem:[%s1953_s5 + $0x110] sm:$0xff] }
  0x99   : > { %v813_v14 = vld [vmem:[%s1953_s5 + $0x190] sm:$0xff] }
  0x9a   : > { %v419_v16 = vmax.f32 %v418_v15, 0.0  ;;  %v841_v15 = vld [vmem:[%s1953_s5 + $0x270] sm:$0xff] }
  0x9c   : > { %1159 = vmatmul.msk.f32.vlgmr.msrb.gmra.mxu0 %vm502_vm1, %v419_v16  ;;  %1160 = vmatmul.msk.f32.vlgmr.msrb.gmra.mxu1 %vm502_vm1, %v419_v16 }
  0x9d   : > { %1161 = vmatmul.msk.f32.vlgmr.msrb.gmra.mxu2 %vm502_vm1, %v419_v16  ;;  %1162 = vmatmul.msk.f32.vlgmr.msrb.gmra.mxu3 %vm502_vm1, %v419_v16 }
  0x9e   : > { %895 = vmatpush.msrb.mxu0 %v778_v17  ;;  %915 = vmatpush.msrb.mxu1 %v794_v18  ;;  %v796_v17 = vld [vmem:[%s1953_s5 + $0x108] sm:$0xff] }
  0x9f   : > { %935 = vmatpush.msrb.mxu2 %v810_v19  ;;  %955 = vmatpush.msrb.mxu3 %v826_v20  ;;  %v812_v18 = vld [vmem:[%s1953_s5 + $0x188] sm:$0xff] }
  0xa0   : > { %896 = vmatpush.msrb.mxu0 %v777_v21  ;;  %916 = vmatpush.msrb.mxu1 %v793_v22  ;;  %v840_v19 = vld [vmem:[%s1953_s5 + $0x268] sm:$0xff]  ;;  %v795_v21 = vld [vmem:[%s1953_s5 + $0x100] sm:$0xff] }
  0xa1   : > { %936 = vmatpush.msrb.mxu2 %v809_v23  ;;  %956 = vmatpush.msrb.mxu3 %v825_v24  ;;  %v856_v20 = vld [vmem:[%s1953_s5 + $0x2e8] sm:$0xff]  ;;  %v811_v22 = vld [vmem:[%s1953_s5 + $0x180] sm:$0xff] }
  0xa2   : > { %897 = vmatpush.msrb.mxu0 %v776_v25  ;;  %917 = vmatpush.msrb.mxu1 %v792_v26  ;;  %v839_v23 = vld [vmem:[%s1953_s5 + $0x260] sm:$0xff]  ;;  %v874_v25 = vld [vmem:[%s1953_s5 + $0x378] sm:$0xff] }
  0xa3   : > { %937 = vmatpush.msrb.mxu2 %v808_v27  ;;  %957 = vmatpush.msrb.mxu3 %v824_v28  ;;  %v855_v24 = vld [vmem:[%s1953_s5 + $0x2e0] sm:$0xff]  ;;  %v890_v26 = vld [vmem:[%s1953_s5 + $0x3f8] sm:$0xff] }
  0xa4   : > { %1163 = vmatmul.msk.f32.vlgmr.msra.gmra.mxu0 %vm502_vm1, %v419_v16  ;;  %1164 = vmatmul.msk.f32.vlgmr.msra.gmra.mxu1 %vm502_vm1, %v419_v16  ;;  %v838_v27 = vld [vmem:[%s1953_s5 + $0x258] sm:$0xff] }
  0xa5   : > { %1165 = vmatmul.msk.f32.vlgmr.msra.gmra.mxu2 %vm502_vm1, %v419_v16  ;;  %1166 = vmatmul.msk.f32.vlgmr.msra.gmra.mxu3 %vm502_vm1, %v419_v16  ;;  %v857_v16 = vld [vmem:[%s1953_s5 + $0x2f0] sm:$0xff]  ;;  %v854_v28 = vld [vmem:[%s1953_s5 + $0x2d8] sm:$0xff] }
  0xa6   : > { %898 = vmatpush.msrb.mxu0 %v775_v29  ;;  %918 = vmatpush.msrb.mxu1 %v791_v30  ;;  %v873_v29 = vld [vmem:[%s1953_s5 + $0x370] sm:$0xff] }
  0xa7   : > { %938 = vmatpush.msrb.mxu2 %v807_v31  ;;  %958 = vmatpush.msrb.mxu3 %v823_v32  ;;  %v889_v30 = vld [vmem:[%s1953_s5 + $0x3f0] sm:$0xff] }
  0xa8   : > { %899 = vmatpush.msrb.mxu0 %v774_v33  ;;  %919 = vmatpush.msrb.mxu1 %v790_v34  ;;  %v837_v31 = vld [vmem:[%s1953_s5 + $0x250] sm:$0xff]  ;;  %v872_v33 = vld [vmem:[%s1953_s5 + $0x368] sm:$0xff] }
  0xa9   : > { %939 = vmatpush.msrb.mxu2 %v806_v35  ;;  %959 = vmatpush.msrb.mxu3 %v822_v36  ;;  %v853_v32 = vld [vmem:[%s1953_s5 + $0x2d0] sm:$0xff]  ;;  %v888_v34 = vld [vmem:[%s1953_s5 + $0x3e8] sm:$0xff] }
  0xaa   : > { %900 = vmatpush.msrb.mxu0 %v773_v37  ;;  %920 = vmatpush.msrb.mxu1 %v789_v38  ;;  %v836_v35 = vld [vmem:[%s1953_s5 + $0x248] sm:$0xff]  ;;  %v871_v37 = vld [vmem:[%s1953_s5 + $0x360] sm:$0xff] }
  0xab   : > { %940 = vmatpush.msrb.mxu2 %v805_v39  ;;  %960 = vmatpush.msrb.mxu3 %v821_v40  ;;  %v852_v36 = vld [vmem:[%s1953_s5 + $0x2c8] sm:$0xff]  ;;  %v887_v38 = vld [vmem:[%s1953_s5 + $0x3e0] sm:$0xff] }
  0xac   : > { %901 = vmatpush.msrb.mxu0 %v772_v41  ;;  %921 = vmatpush.msrb.mxu1 %v788_v42  ;;  %v835_v39 = vld [vmem:[%s1953_s5 + $0x240] sm:$0xff]  ;;  %v870_v41 = vld [vmem:[%s1953_s5 + $0x358] sm:$0xff] }
  0xad   : > { %941 = vmatpush.msrb.mxu2 %v804_v43  ;;  %961 = vmatpush.msrb.mxu3 %v820_v44  ;;  %v851_v40 = vld [vmem:[%s1953_s5 + $0x2c0] sm:$0xff]  ;;  %v886_v42 = vld [vmem:[%s1953_s5 + $0x3d8] sm:$0xff] }
  0xae   : > { %902 = vmatpush.msrb.mxu0 %v771_v45  ;;  %922 = vmatpush.msrb.mxu1 %v787_v46  ;;  %v834_v43 = vld [vmem:[%s1953_s5 + $0x238] sm:$0xff]  ;;  %v869_v45 = vld [vmem:[%s1953_s5 + $0x350] sm:$0xff] }
  0xaf   : > { %942 = vmatpush.msrb.mxu2 %v803_v47  ;;  %962 = vmatpush.msrb.mxu3 %v819_v48  ;;  %v850_v44 = vld [vmem:[%s1953_s5 + $0x2b8] sm:$0xff]  ;;  %v885_v46 = vld [vmem:[%s1953_s5 + $0x3d0] sm:$0xff] }
  0xb0   : > { %903 = vmatpush.msrb.mxu0 %v770_v49  ;;  %923 = vmatpush.msrb.mxu1 %v786_v50  ;;  %v833_v47 = vld [vmem:[%s1953_s5 + $0x230] sm:$0xff]  ;;  %v868_v49 = vld [vmem:[%s1953_s5 + $0x348] sm:$0xff] }
  0xb1   : > { %943 = vmatpush.msrb.mxu2 %v802_v51  ;;  %963 = vmatpush.msrb.mxu3 %v818_v52  ;;  %v849_v48 = vld [vmem:[%s1953_s5 + $0x2b0] sm:$0xff]  ;;  %v884_v50 = vld [vmem:[%s1953_s5 + $0x3c8] sm:$0xff] }
  0xb2   : > { %904 = vmatpush.msrb.mxu0 %v769_v53  ;;  %924 = vmatpush.msrb.mxu1 %v785_v54  ;;  %v832_v51 = vld [vmem:[%s1953_s5 + $0x228] sm:$0xff]  ;;  %v867_v53 = vld [vmem:[%s1953_s5 + $0x340] sm:$0xff] }
  0xb3   : > { %944 = vmatpush.msrb.mxu2 %v801_v55  ;;  %964 = vmatpush.msrb.mxu3 %v817_v56  ;;  %v848_v52 = vld [vmem:[%s1953_s5 + $0x2a8] sm:$0xff]  ;;  %v883_v54 = vld [vmem:[%s1953_s5 + $0x3c0] sm:$0xff] }
  0xb4   : > { %905 = vmatpush.msrb.mxu0 %v768_v57  ;;  %925 = vmatpush.msrb.mxu1 %v784_v58  ;;  %v831_v55 = vld [vmem:[%s1953_s5 + $0x220] sm:$0xff]  ;;  %v866_v57 = vld [vmem:[%s1953_s5 + $0x338] sm:$0xff] }
  0xb5   : > { %945 = vmatpush.msrb.mxu2 %v800_v59  ;;  %965 = vmatpush.msrb.mxu3 %v816_v60  ;;  %v847_v56 = vld [vmem:[%s1953_s5 + $0x2a0] sm:$0xff]  ;;  %v882_v58 = vld [vmem:[%s1953_s5 + $0x3b8] sm:$0xff] }
  0xb6   : > { %906 = vmatpush.msrb.mxu0 %v767_v61  ;;  %926 = vmatpush.msrb.mxu1 %v783_v62  ;;  %v1799_v59 = vld [vmem:[%s1952_s4] sm:$0xff]  ;;  %v830_v60 = vld [vmem:[%s1953_s5 + $0x218] sm:$0xff]  ;;  %v865_v62 = vld [vmem:[%s1953_s5 + $0x330] sm:$0xff] }
  0xb7   : > { %946 = vmatpush.msrb.mxu2 %v799_v63  ;;  %966 = vmatpush.msrb.mxu3 %v815_v0  ;;  %v846_v61 = vld [vmem:[%s1953_s5 + $0x298] sm:$0xff]  ;;  %v881_v63 = vld [vmem:[%s1953_s5 + $0x3b0] sm:$0xff] }
  0xb8   : > { %907 = vmatpush.msrb.mxu0 %v766_v1  ;;  %927 = vmatpush.msrb.mxu1 %v782_v2  ;;  %v829_v0 = vld [vmem:[%s1953_s5 + $0x210] sm:$0xff]  ;;  %v864_v2 = vld [vmem:[%s1953_s5 + $0x328] sm:$0xff] }
  0xb9   : > { %947 = vmatpush.msrb.mxu2 %v798_v9  ;;  %967 = vmatpush.msrb.mxu3 %v814_v10  ;;  %v845_v1 = vld [vmem:[%s1953_s5 + $0x290] sm:$0xff]  ;;  %v879_v9 = vld [vmem:[%s1953_s5 + $0x3a0] sm:$0xff] }
  0xba   : > { %908 = vmatpush.msrb.mxu0 %v765_v3  ;;  %928 = vmatpush.msrb.mxu1 %v781_v4  ;;  %v880_v3 = vld [vmem:[%s1953_s5 + $0x3a8] sm:$0xff] }
  0xbb   : > { %948 = vmatpush.msrb.mxu2 %v797_v13  ;;  %968 = vmatpush.msrb.mxu3 %v813_v14  ;;  %v828_v4 = vld [vmem:[%s1953_s5 + $0x208] sm:$0xff]  ;;  %v827_v14 = vld [vmem:[%s1953_s5 + $0x200] sm:$0xff] }
  0xbc   : > { %909 = vmatpush.msrb.mxu0 %v764_v5  ;;  %929 = vmatpush.msrb.mxu1 %v780_v6  ;;  %v844_v5 = vld [vmem:[%s1953_s5 + $0x288] sm:$0xff]  ;;  %v486_v6 = vperm.slane %v1799_v59, 0 }
  0xbd   : > { %949 = vmatpush.msrb.mxu2 %v796_v17  ;;  %969 = vmatpush.msrb.mxu3 %v812_v18  ;;  %v878_v17 = vld [vmem:[%s1953_s5 + $0x398] sm:$0xff] }
  0xbe   : > { %910 = vmatpush.msrb.mxu0 %v763_v7  ;;  %930 = vmatpush.msrb.mxu1 %v779_v8  ;;  %v487_v7 = vperm.slane %v1799_v59, 1  ;;  %v863_v8 = vld [vmem:[%s1953_s5 + $0x320] sm:$0xff] }
  0xbf   : > { %950 = vmatpush.msrb.mxu2 %v795_v21  ;;  %970 = vmatpush.msrb.mxu3 %v811_v22  ;;  %v861_v21 = vld [vmem:[%s1953_s5 + $0x310] sm:$0xff] }
  0xc0   : > { %975 = vmatpush.msra.mxu0 %v842_v11  ;;  %995 = vmatpush.msra.mxu1 %v858_v12  ;;  %v877_v22 = vld [vmem:[%s1953_s5 + $0x390] sm:$0xff] }
  0xc1   : > { %1015 = vmatpush.msra.mxu2 %v874_v25  ;;  %1035 = vmatpush.msra.mxu3 %v890_v26  ;;  %v490_v25 = vperm.slane %v1799_v59, 4  ;;  %v860_v26 = vld [vmem:[%s1953_s5 + $0x308] sm:$0xff] }
  0xc2   : > { %976 = vmatpush.msra.mxu0 %v841_v15  ;;  %996 = vmatpush.msra.mxu1 %v857_v16  ;;  %v843_v15 = vld [vmem:[%s1953_s5 + $0x280] sm:$0xff]  ;;  %v862_v16 = vld [vmem:[%s1953_s5 + $0x318] sm:$0xff] }
  0xc3   : > { %1016 = vmatpush.msra.mxu2 %v873_v29  ;;  %1036 = vmatpush.msra.mxu3 %v889_v30 }
  0xc4   : > { %977 = vmatpush.msra.mxu0 %v840_v19  ;;  %997 = vmatpush.msra.mxu1 %v856_v20 }
  0xc5   : > { %1017 = vmatpush.msra.mxu2 %v872_v33  ;;  %1037 = vmatpush.msra.mxu3 %v888_v34 }
  0xc6   : > { %978 = vmatpush.msra.mxu0 %v839_v23  ;;  %998 = vmatpush.msra.mxu1 %v855_v24  ;;  %v488_v23 = vperm.slane %v1799_v59, 2  ;;  %v489_v24 = vperm.slane %v1799_v59, 3 }
  0xc7   : > { %1018 = vmatpush.msra.mxu2 %v871_v37  ;;  %1038 = vmatpush.msra.mxu3 %v887_v38  ;;  %v875_v37 = vld [vmem:[%s1953_s5 + $0x380] sm:$0xff] }
  0xc8   : > { %979 = vmatpush.msra.mxu0 %v838_v27  ;;  %999 = vmatpush.msra.mxu1 %v854_v28  ;;  %v876_v27 = vld [vmem:[%s1953_s5 + $0x388] sm:$0xff] }
  0xc9   : > { %1019 = vmatpush.msra.mxu2 %v870_v41  ;;  %1039 = vmatpush.msra.mxu3 %v886_v42  ;;  %v492_v42 = vperm.slane %v1799_v59, 6 }
  0xca   : > { %980 = vmatpush.msra.mxu0 %v837_v31  ;;  %1000 = vmatpush.msra.mxu1 %v853_v32  ;;  %v491_v31 = vperm.slane %v1799_v59, 5  ;;  %v859_v32 = vld [vmem:[%s1953_s5 + $0x300] sm:$0xff] }
  0xcb   : > { %1020 = vmatpush.msra.mxu2 %v869_v45  ;;  %1040 = vmatpush.msra.mxu3 %v885_v46 }
  0xcc   : > { %981 = vmatpush.msra.mxu0 %v836_v35  ;;  %1001 = vmatpush.msra.mxu1 %v852_v36 }
  0xcd   : > { %1021 = vmatpush.msra.mxu2 %v868_v49  ;;  %1041 = vmatpush.msra.mxu3 %v884_v50  ;;  %v493_v50 = vperm.slane %v1799_v59, 7 }
  0xce   : > { %982 = vmatpush.msra.mxu0 %v835_v39  ;;  %1002 = vmatpush.msra.mxu1 %v851_v40 }
  0xcf   : > { %1022 = vmatpush.msra.mxu2 %v867_v53  ;;  %1042 = vmatpush.msra.mxu3 %v883_v54 }
  0xd0   : > { %983 = vmatpush.msra.mxu0 %v834_v43  ;;  %1003 = vmatpush.msra.mxu1 %v850_v44 }
  0xd1   : > { %1023 = vmatpush.msra.mxu2 %v866_v57  ;;  %1043 = vmatpush.msra.mxu3 %v882_v58 }
  0xd2   : > { %984 = vmatpush.msra.mxu0 %v833_v47  ;;  %1004 = vmatpush.msra.mxu1 %v849_v48 }
  0xd3   : > { %1024 = vmatpush.msra.mxu2 %v865_v62  ;;  %1044 = vmatpush.msra.mxu3 %v881_v63 }
  0xd4   : > { %985 = vmatpush.msra.mxu0 %v832_v51  ;;  %1005 = vmatpush.msra.mxu1 %v848_v52 }
  0xd5   : > { %1025 = vmatpush.msra.mxu2 %v864_v2  ;;  %1045 = vmatpush.msra.mxu3 %v880_v3 }
  0xd6   : > { %986 = vmatpush.msra.mxu0 %v831_v55  ;;  %1006 = vmatpush.msra.mxu1 %v847_v56 }
  0xd7   : > { %1026 = vmatpush.msra.mxu2 %v863_v8  ;;  %1046 = vmatpush.msra.mxu3 %v879_v9 }
  0xd8   : > { %987 = vmatpush.msra.mxu0 %v830_v60  ;;  %1007 = vmatpush.msra.mxu1 %v846_v61 }
  0xd9   : > { %1027 = vmatpush.msra.mxu2 %v862_v16  ;;  %1047 = vmatpush.msra.mxu3 %v878_v17 }
  0xda   : > { %988 = vmatpush.msra.mxu0 %v829_v0  ;;  %1008 = vmatpush.msra.mxu1 %v845_v1 }
  0xdb   : > { %1028 = vmatpush.msra.mxu2 %v861_v21  ;;  %1048 = vmatpush.msra.mxu3 %v877_v22 }
  0xdc   : > { %989 = vmatpush.msra.mxu0 %v828_v4  ;;  %1009 = vmatpush.msra.mxu1 %v844_v5 }
  0xdd   : > { %1029 = vmatpush.msra.mxu2 %v860_v26  ;;  %1049 = vmatpush.msra.mxu3 %v876_v27 }
  0xde   : > { %990 = vmatpush.msra.mxu0 %v827_v14  ;;  %1010 = vmatpush.msra.mxu1 %v843_v15 }
  0xdf   : > { %1030 = vmatpush.msra.mxu2 %v859_v32  ;;  %1050 = vmatpush.msra.mxu3 %v875_v37 }
 0x119   : > { %v523_v10 = vpop.f32.mrf.mxu0  ;;  %v543_v11 = vpop.f32.mrf.mxu1 }
 0x11a   : > { %v1839_v12 = vadd.f32 %v523_v10, %v486_v6  ;;  %v1841_v13 = vadd.f32 %v543_v11, %v487_v7 }
 0x11c   : > { %v699_v18 = vmul.f32 %v1839_v12, %v1839_v12  ;;  %v674_v19 = vrot.slane %v1841_v13, 4  ;;  %v700_v20 = vmul.f32 %v1841_v13, %v1841_v13  ;;  %v691_v8 = vmul.f32 0.5, %v1839_v12 }
 0x11e   : > { %v707_v28 = vmul.f32 %v699_v18, %v1839_v12  ;;  %v679_v29 = vsel %vm678_vm2, %v1839_v12, %v674_v19  ;;  %v708_v30 = vmul.f32 %v700_v20, %v1841_v13 }
 0x11f   : > { %687 = vst [vmem:[%s1860_s11] sm:$0xff] %v679_v29 }
 0x120   : > { %v715_v33 = vmul.f32 0.044715, %v707_v28  ;;  %v716_v34 = vmul.f32 0.044715, %v708_v30  ;;  %v563_v35 = vpop.f32.mrf.mxu2  ;;  %v583_v36 = vpop.f32.mrf.mxu3 }
 0x121   : > { %v1894_v38 = vadd.f32 %v563_v35, %v488_v23  ;;  %v1896_v39 = vadd.f32 %v583_v36, %v489_v24  ;;  %v603_v40 = vpop.f32.mrf.mxu0  ;;  %v623_v41 = vpop.f32.mrf.mxu1 }
 0x122   : > { %v1899_v43 = vadd.f32 %v603_v40, %v490_v25  ;;  %v1901_v44 = vadd.f32 %v623_v41, %v491_v31  ;;  %v723_v45 = vadd.f32 %v715_v33, %v1839_v12  ;;  %v724_v46 = vadd.f32 %v716_v34, %v1841_v13 }
 0x123   : > { %v701_v47 = vmul.f32 %v1894_v38, %v1894_v38  ;;  %v675_v48 = vrot.slane %v1896_v39, 4  ;;  %v702_v49 = vmul.f32 %v1896_v39, %v1896_v39  ;;  %v692_v12 = vmul.f32 0.5, %v1841_v13 }
 0x124   : > { %v703_v51 = vmul.f32 %v1899_v43, %v1899_v43  ;;  %v676_v52 = vrot.slane %v1901_v44, 4  ;;  %v704_v53 = vmul.f32 %v1901_v44, %v1901_v44  ;;  %v731_v54 = vmul.f32 0.7978846, %v723_v45 }
 0x125   : > { %v709_v55 = vmul.f32 %v701_v47, %v1894_v38  ;;  %v680_v56 = vsel %vm678_vm2, %v1894_v38, %v675_v48  ;;  %v710_v57 = vmul.f32 %v702_v49, %v1896_v39  ;;  %v732_v58 = vmul.f32 0.7978846, %v724_v46 }
 0x126   : > { %688 = vst [vmem:[%s1860_s11 + $0x8] sm:$0xff] %v680_v56  ;;  %v711_v59 = vmul.f32 %v703_v51, %v1899_v43  ;;  %v681_v60 = vsel %vm678_vm2, %v1899_v43, %v676_v52  ;;  %v712_v61 = vmul.f32 %v704_v53, %v1901_v44  ;;  %1182 = vtanh.f32 %v731_v54 }
 0x127   : > { %v717_v62 = vmul.f32 0.044715, %v709_v55  ;;  %v718_v63 = vmul.f32 0.044715, %v710_v57  ;;  %689 = vst [vmem:[%s1860_s11 + $0x10] sm:$0xff] %v681_v60  ;;  %1184 = vtanh.f32 %v732_v58  ;;  %v693_v37 = vmul.f32 0.5, %v1894_v38 }
 0x128   : > { %v719_v0 = vmul.f32 0.044715, %v711_v59  ;;  %v720_v1 = vmul.f32 0.044715, %v712_v61  ;;  %v643_v2 = vpop.f32.mrf.mxu2  ;;  %v663_v3 = vpop.f32.mrf.mxu3  ;;  %v694_v41 = vmul.f32 0.5, %v1896_v39  ;;  %v695_v47 = vmul.f32 0.5, %v1899_v43 }
 0x129   : > { %v644_v4 = vadd.f32 %v643_v2, %v492_v42  ;;  %v664_v5 = vadd.f32 %v663_v3, %v493_v50  ;;  %v725_v6 = vadd.f32 %v717_v62, %v1894_v38  ;;  %v726_v7 = vadd.f32 %v718_v63, %v1896_v39 }
 0x12a   : > { %v727_v9 = vadd.f32 %v719_v0, %v1899_v43  ;;  %v728_v10 = vadd.f32 %v720_v1, %v1901_v44  ;;  %v696_v50 = vmul.f32 0.5, %v1901_v44  ;;  %v1181_v43 = vld [vmem:[%s1954_s6] ss:$0 sm:$0xff] }
 0x12b   : > { %v705_v11 = vmul.f32 %v644_v4, %v644_v4  ;;  %v677_v14 = vrot.slane %v664_v5, 4  ;;  %v706_v15 = vmul.f32 %v664_v5, %v664_v5  ;;  %v733_v16 = vmul.f32 0.7978846, %v725_v6 }
 0x12c   : > { %v1183_v17 = vpop.eup %1182  ;;  %v734_v18 = vmul.f32 0.7978846, %v726_v7  ;;  %v735_v19 = vmul.f32 0.7978846, %v727_v9  ;;  %v736_v20 = vmul.f32 0.7978846, %v728_v10 }
 0x12d   : > { %v1185_v21 = vpop.eup %1184  ;;  %v713_v22 = vmul.f32 %v705_v11, %v644_v4  ;;  %v682_v23 = vsel %vm678_vm2, %v644_v4, %v677_v14  ;;  %v714_v24 = vmul.f32 %v706_v15, %v664_v5  ;;  %v747_v25 = vadd.f32 1.0, %v1183_v17 }
 0x12e   : > { %690 = vst [vmem:[%s1860_s11 + $0x18] sm:$0xff] %v682_v23  ;;  %v748_v26 = vadd.f32 1.0, %v1185_v21  ;;  %1186 = vtanh.f32 %v733_v16  ;;  %v697_v39 = vmul.f32 0.5, %v644_v4  ;;  %v698_v56 = vmul.f32 0.5, %v664_v5 }
 0x12f   : > { %v721_v27 = vmul.f32 0.044715, %v713_v22  ;;  %v722_v28 = vmul.f32 0.044715, %v714_v24  ;;  %v755_v29 = vmul.f32 %v747_v25, %v691_v8  ;;  %1188 = vtanh.f32 %v734_v18 }
 0x130   : > { %v756_v30 = vmul.f32 %v748_v26, %v692_v12  ;;  %1190 = vtanh.f32 %v735_v19 }
 0x131   : > { %911 = vmatmul.f32.vlgmr.msrb.gmra.mxu0 %v755_v29  ;;  %1192 = vtanh.f32 %v736_v20  ;;  %v729_v31 = vadd.f32 %v721_v27, %v644_v4  ;;  %v730_v32 = vadd.f32 %v722_v28, %v664_v5 }
 0x132   : > { %931 = vmatmul.f32.vlgmr.msrb.gmra.mxu1 %v756_v30 }
 0x133   : > { %v737_v33 = vmul.f32 0.7978846, %v729_v31  ;;  %v738_v34 = vmul.f32 0.7978846, %v730_v32 }
 0x134   : > { %v1187_v35 = vpop.eup %1186 }
 0x135   : > { %v1189_v36 = vpop.eup %1188  ;;  %v749_v13 = vadd.f32 1.0, %v1187_v35  ;;  %1194 = vtanh.f32 %v737_v33 }
 0x136   : > { %v1191_v40 = vpop.eup %1190  ;;  %v750_v42 = vadd.f32 1.0, %v1189_v36  ;;  %1196 = vtanh.f32 %v738_v34 }
 0x137   : > { %v1193_v45 = vpop.eup %1192  ;;  %v757_v46 = vmul.f32 %v749_v13, %v693_v37  ;;  %v751_v48 = vadd.f32 1.0, %v1191_v40 }
 0x138   : > { %v758_v49 = vmul.f32 %v750_v42, %v694_v41  ;;  %v752_v51 = vadd.f32 1.0, %v1193_v45 }
 0x139   : > { %951 = vmatmul.f32.vlgmr.msrb.gmra.mxu2 %v757_v46  ;;  %v759_v52 = vmul.f32 %v751_v48, %v695_v47 }
 0x13a   : > { %971 = vmatmul.f32.vlgmr.msrb.gmra.mxu3 %v758_v49  ;;  %v760_v38 = vmul.f32 %v752_v51, %v696_v50 }
 0x13b   : > { %v1195_v53 = vpop.eup %1194  ;;  %991 = vmatmul.f32.vlgmr.msra.gmra.mxu0 %v759_v52 }
 0x13c   : > { %v1197_v54 = vpop.eup %1196  ;;  %1011 = vmatmul.f32.vlgmr.msra.gmra.mxu1 %v760_v38  ;;  %v753_v55 = vadd.f32 1.0, %v1195_v53 }
 0x13d   : > { %v754_v57 = vadd.f32 1.0, %v1197_v54 }
 0x13e   : > { %v761_v58 = vmul.f32 %v753_v55, %v697_v39 }
 0x13f   : > { %v762_v59 = vmul.f32 %v754_v57, %v698_v56 }
 0x141   : > { %1031 = vmatmul.f32.vlgmr.msra.gmra.mxu2 %v761_v58 }
 0x142   : > { %1051 = vmatmul.f32.vlgmr.msra.gmra.mxu3 %v762_v59 }
 0x1ae   : > { %v912_v44 = vpop.f32.mrf.mxu0 }
 0x1af   : > { %v913_v60 = vadd.f32 %v1181_v43, %v912_v44  ;;  %v932_v61 = vpop.f32.mrf.mxu1 }
 0x1b1   : > { %v933_v62 = vadd.f32 %v932_v61, %v913_v60 }
 0x1b8   : > { %v992_v3 = vpop.f32.mrf.mxu0 }
 0x1b9   : > { %v1012_v5 = vpop.f32.mrf.mxu1 }
 0x1bc   : > { %v952_v63 = vpop.f32.mrf.mxu2 }
 0x1bd   : > { %v953_v0 = vadd.f32 %v952_v63, %v933_v62  ;;  %v972_v1 = vpop.f32.mrf.mxu3 }
 0x1bf   : > { %v973_v2 = vadd.f32 %v972_v1, %v953_v0 }
 0x1c1   : > { %v993_v4 = vadd.f32 %v992_v3, %v973_v2 }
 0x1c3   : > { %v1013_v6 = vadd.f32 %v1012_v5, %v993_v4 }
 0x1c4   : > { %v1032_v7 = vpop.f32.mrf.mxu2 }
 0x1c5   : > { %v1033_v8 = vadd.f32 %v1032_v7, %v1013_v6  ;;  %v1052_v9 = vpop.f32.mrf.mxu3 }
 0x1c7   : > { %v1053_v10 = vadd.f32 %v1052_v9, %v1033_v8 }
 0x1c9   : > { %1055 = vst [vmem:[%s316_s30] sm:$0xf] %v1053_v10 }
 0x1ca PF: > { %s19_s27 = sadd.s32 1, %s1204_s27  }
 0x1cb   : > { %p16_p4 = scmp.ge.s32.totalorder %s19_s27, 4  }
 0x1cd   :  { %18 = sbr.rel (!%p16_p4) target bundleno = 1 (0x1), region = 93 }

// kernel: _lambda_.3
= control target key start
LH: loop header
LB: loop body
LE: loop exit
PB: predicated region body
PF: predicated region fallthrough
CT: control target
= control target key end

     0   :  { %s1504_s27 = smov 0   ;;  %s2083_s0 = inlined_call_operand.vmem [shape: f32[2,16,8,16], index: 0, kind: input, shape index: {}]   ;;  %s2084_s1 = inlined_call_operand.vmem [shape: f32[4,8], index: 1, kind: input, shape index: {}]   ;;  %s2085_s2 = inlined_call_operand.vmem [shape: f32[4,1], index: 2, kind: input, shape index: {}]   ;;  %s2086_s3 = inlined_call_operand.vmem [shape: f32[16,1024], index: 3, kind: input, shape index: {}]   ;;  %s2087_s4 = inlined_call_operand.vmem [shape: f32[1,1024], index: 4, kind: input, shape index: {}]   ;;  %s2088_s5 = inlined_call_operand.vmem [shape: f32[1024,128], index: 5, kind: input, shape index: {}]   ;;  %s2089_s6 = inlined_call_operand.vmem [shape: f32[1,128], index: 6, kind: input, shape index: {}]   ;;  %s2090_s7 = inlined_call_operand.vmem [shape: f32[2,4,1024], index: 7, kind: output, shape index: {0}]   ;;  %s2091_s8 = inlined_call_operand.vmem [shape: f32[2,4,128], index: 8, kind: output, shape index: {1}]  }
   0x1 LB: > { %s1370_s28 = sadd.s32 4294967295, %s1456_s27   ;;  %p1374_p0 = scmp.ge.s32.totalorder %s1456_s27, 1  ;;  %s1456_s27 = sphi %s1504_s27, %s19_s27  }
   0x2   : > { %p265_p1 = scmp.lt.s32.totalorder %s1456_s27, 3 }
   0x4   : > { %p266_p2 = pnand %p1374_p0, %p265_p1 }
   0x5   : > { %p303_p3 = scmp.lt.s32.totalorder (!%p266_p2), %s1370_s28, 1 }
   0x6   : > { %269 = sbr.rel (%p266_p2) target bundleno = 483 (0x1e3), region = 48 }
   0xb   : > { %s2093_s28 = smov (!%p303_p3, %s1370_s28), 1  ;;  %v688_v0 = vld [vmem:[%s2085_s2] sm:$0xf]  ;;  %v1458_v1 = vmov 0   ;;  %vm319_vm0 = vcmask 64512   ;;  %v706_v19 = vld [vmem:[%s2086_s3 + $0x50] sm:$0xff] }
   0xc   : > { %s1421_s9 = sshll.u32 %s2093_s28, 7  ;;  %1432 = vset.pattern.permute.xlu0 %v1458_v1  ;;  %v317_v2 = vld [vmem:[%s2084_s1] sm:$0xf]  ;;  %v707_v22 = vld [vmem:[%s2086_s3 + $0x58] sm:$0xff]  ;;  %v705_v24 = vld [vmem:[%s2086_s3 + $0x48] sm:$0xff]  ;;  %vm730_vm1 = vcmask 130048  }
   0xd   : > { %s1521_s12 = scalar_lea.vmem %s2083_s0, %s1421_s9  ;;  %691 = vperm.xlu0 %1432, %v688_v0   ;;  %v704_v23 = vld [vmem:[%s2086_s3 + $0x40] sm:$0xff]  ;;  %v698_v27 = vld [vmem:[%s2086_s3 + $0x10] sm:$0xff]  ;;  %v699_v28 = vld [vmem:[%s2086_s3 + $0x18] sm:$0xff]  ;;  %s1422_s25 = sshll.u32 %s2093_s28, 5  ;;  %vm906_vm2 = vcmask 1043456  }
   0xe   : > { %v1383_v3 = vld [vmem:[%s1521_s12 + $0x10] sm:$0xff]  ;;  %v318_v5 = vld [vmem:[%s1521_s12] sm:$0xff]  ;;  %v1381_v6 = vld [vmem:[%s1521_s12 + $0x8] sm:$0xff]  ;;  %s1997_s16 = scalar_lea.vmem %s2090_s7, %s1422_s25  ;;  %s1379_s11 = sshll.u32 %s2093_s28, 2 }
   0xf   : > { %v1391_v4 = vld [vmem:[%s1521_s12 + $0x30] sm:$0xff]  ;;  %383 = vmatpush.msra.mxu2 %v1383_v3  ;;  %338 = vmatpush.msra.mxu0 %v318_v5  ;;  %v1385_v7 = vld [vmem:[%s1521_s12 + $0x18] sm:$0xff]  ;;  %v1387_v8 = vld [vmem:[%s1521_s12 + $0x20] sm:$0xff]  ;;  %s316_s14 = scalar_lea.vmem %s2091_s8, %s1379_s11 }
  0x10   : > { %1384 = vmatmul.msk.f32.vlgmr.msra.gmra.mxu2 %vm319_vm0, %v317_v2  ;;  %360 = vmatpush.msra.mxu1 %v1381_v6  ;;  %v1393_v9 = vld [vmem:[%s1521_s12 + $0x38] sm:$0xff]  ;;  %v1389_v10 = vld [vmem:[%s1521_s12 + $0x28] sm:$0xff]  ;;  %v1399_v11 = vld [vmem:[%s1521_s12 + $0x50] sm:$0xff] }
  0x11   : > { %475 = vmatpush.msrb.mxu2 %v1391_v4  ;;  %406 = vmatpush.msra.mxu3 %v1385_v7  ;;  %v1395_v12 = vld [vmem:[%s1521_s12 + $0x40] sm:$0xff]  ;;  %v1401_v13 = vld [vmem:[%s1521_s12 + $0x58] sm:$0xff]  ;;  %v1397_v14 = vld [vmem:[%s1521_s12 + $0x48] sm:$0xff] }
  0x12   : > { %1380 = vmatmul.msk.f32.vlgmr.msra.gmra.mxu0 %vm319_vm0, %v317_v2  ;;  %1382 = vmatmul.msk.f32.vlgmr.msra.gmra.mxu1 %vm319_vm0, %v317_v2  ;;  %v1407_v15 = vld [vmem:[%s1521_s12 + $0x70] sm:$0xff]  ;;  %v1403_v16 = vld [vmem:[%s1521_s12 + $0x60] sm:$0xff]  ;;  %v1409_v17 = vld [vmem:[%s1521_s12 + $0x78] sm:$0xff] }
  0x13   : > { %1386 = vmatmul.msk.f32.vlgmr.msra.gmra.mxu3 %vm319_vm0, %v317_v2  ;;  %429 = vmatpush.msrb.mxu0 %v1387_v8  ;;  %v1405_v18 = vld [vmem:[%s1521_s12 + $0x68] sm:$0xff]  ;;  %v696_v29 = vld [vmem:[%s2086_s3] sm:$0xff]  ;;  %v710_v33 = vld [vmem:[%s2086_s3 + $0x70] sm:$0xff] }
  0x14   : > { %498 = vmatpush.msrb.mxu3 %v1393_v9  ;;  %452 = vmatpush.msrb.mxu1 %v1389_v10  ;;  %v697_v31 = vld [vmem:[%s2086_s3 + $0x8] sm:$0xff]  ;;  %v711_v34 = vld [vmem:[%s2086_s3 + $0x78] sm:$0xff]  ;;  %v702_v35 = vld [vmem:[%s2086_s3 + $0x30] sm:$0xff] }
  0x15   : > { %567 = vmatpush.msra.mxu2 %v1399_v11  ;;  %521 = vmatpush.msra.mxu0 %v1395_v12  ;;  %v708_v39 = vld [vmem:[%s2086_s3 + $0x60] sm:$0xff]  ;;  %v709_v40 = vld [vmem:[%s2086_s3 + $0x68] sm:$0xff]  ;;  %v703_v41 = vld [vmem:[%s2086_s3 + $0x38] sm:$0xff] }
  0x16   : > { %590 = vmatpush.msra.mxu3 %v1401_v13  ;;  %544 = vmatpush.msra.mxu1 %v1397_v14  ;;  %v700_v42 = vld [vmem:[%s2086_s3 + $0x20] sm:$0xff]  ;;  %v701_v43 = vld [vmem:[%s2086_s3 + $0x28] sm:$0xff]  ;;  %v1006_v5 = vld [vmem:[%s2088_s5 + $0x78] sm:$0xff] }
  0x17   : > { %v1022_v6 = vld [vmem:[%s2088_s5 + $0xf8] sm:$0xff]  ;;  %v1005_v9 = vld [vmem:[%s2088_s5 + $0x70] sm:$0xff]  ;;  %v1004_v13 = vld [vmem:[%s2088_s5 + $0x68] sm:$0xff] }
  0x18   : > { %1392 = vmatmul.msk.f32.vlgmr.msrb.gmra.mxu2 %vm319_vm0, %v317_v2  ;;  %v1038_v7 = vld [vmem:[%s2088_s5 + $0x178] sm:$0xff]  ;;  %v1021_v10 = vld [vmem:[%s2088_s5 + $0xf0] sm:$0xff]  ;;  %v1020_v14 = vld [vmem:[%s2088_s5 + $0xe8] sm:$0xff] }
  0x19   : > { %659 = vmatpush.msrb.mxu2 %v1407_v15  ;;  %v1054_v8 = vld [vmem:[%s2088_s5 + $0x1f8] sm:$0xff]  ;;  %v1037_v11 = vld [vmem:[%s2088_s5 + $0x170] sm:$0xff]  ;;  %v1036_v15 = vld [vmem:[%s2088_s5 + $0x168] sm:$0xff] }
  0x1a   : > { %1388 = vmatmul.msk.f32.vlgmr.msrb.gmra.mxu0 %vm319_vm0, %v317_v2  ;;  %1390 = vmatmul.msk.f32.vlgmr.msrb.gmra.mxu1 %vm319_vm0, %v317_v2  ;;  %v1053_v12 = vld [vmem:[%s2088_s5 + $0x1f0] sm:$0xff] }
  0x1b   : > { %1394 = vmatmul.msk.f32.vlgmr.msrb.gmra.mxu3 %vm319_vm0, %v317_v2  ;;  %613 = vmatpush.msrb.mxu0 %v1403_v16  ;;  %v1052_v16 = vld [vmem:[%s2088_s5 + $0x1e8] sm:$0xff] }
  0x1c   : > { %682 = vmatpush.msrb.mxu3 %v1409_v17  ;;  %636 = vmatpush.msrb.mxu1 %v1405_v18  ;;  %v1003_v17 = vld [vmem:[%s2088_s5 + $0x60] sm:$0xff] }
  0x1d   : > { %v1019_v18 = vld [vmem:[%s2088_s5 + $0xe0] sm:$0xff] }
  0x20   : > { %1400 = vmatmul.msk.f32.vlgmr.msra.gmra.mxu2 %vm319_vm0, %v317_v2 }
  0x21   : > { %788 = vmatpush.msra.mxu2 %v706_v19  ;;  %v1035_v19 = vld [vmem:[%s2088_s5 + $0x160] sm:$0xff] }
  0x22   : > { %1396 = vmatmul.msk.f32.vlgmr.msra.gmra.mxu0 %vm319_vm0, %v317_v2  ;;  %1398 = vmatmul.msk.f32.vlgmr.msra.gmra.mxu1 %vm319_vm0, %v317_v2 }
  0x23   : > { %1402 = vmatmul.msk.f32.vlgmr.msra.gmra.mxu3 %vm319_vm0, %v317_v2  ;;  %748 = vmatpush.msra.mxu0 %v704_v23  ;;  %v1034_v23 = vld [vmem:[%s2088_s5 + $0x158] sm:$0xff] }
  0x24   : > { %808 = vmatpush.msra.mxu3 %v707_v22  ;;  %768 = vmatpush.msra.mxu1 %v705_v24  ;;  %v1018_v22 = vld [vmem:[%s2088_s5 + $0xd8] sm:$0xff] }
  0x25   : > { %789 = vmatpush.msra.mxu2 %v698_v27  ;;  %749 = vmatpush.msra.mxu0 %v696_v29  ;;  %v1050_v24 = vld [vmem:[%s2088_s5 + $0x1d8] sm:$0xff]  ;;  %v1033_v27 = vld [vmem:[%s2088_s5 + $0x150] sm:$0xff]  ;;  %v1000_v29 = vld [vmem:[%s2088_s5 + $0x48] sm:$0xff] }
  0x26   : > { %809 = vmatpush.msra.mxu3 %v699_v28  ;;  %769 = vmatpush.msra.mxu1 %v697_v31  ;;  %v1049_v28 = vld [vmem:[%s2088_s5 + $0x1d0] sm:$0xff]  ;;  %v1032_v31 = vld [vmem:[%s2088_s5 + $0x148] sm:$0xff] }
  0x28   : > { %1408 = vmatmul.msk.f32.vlgmr.msrb.gmra.mxu2 %vm319_vm0, %v317_v2 }
  0x29   : > { %868 = vmatpush.msrb.mxu2 %v710_v33  ;;  %v999_v33 = vld [vmem:[%s2088_s5 + $0x40] sm:$0xff] }
  0x2a   : > { %1404 = vmatmul.msk.f32.vlgmr.msrb.gmra.mxu0 %vm319_vm0, %v317_v2  ;;  %1406 = vmatmul.msk.f32.vlgmr.msrb.gmra.mxu1 %vm319_vm0, %v317_v2 }
  0x2b   : > { %1410 = vmatmul.msk.f32.vlgmr.msrb.gmra.mxu3 %vm319_vm0, %v317_v2  ;;  %828 = vmatpush.msrb.mxu0 %v708_v39  ;;  %v1030_v39 = vld [vmem:[%s2088_s5 + $0x138] sm:$0xff] }
  0x2c   : > { %888 = vmatpush.msrb.mxu3 %v711_v34  ;;  %848 = vmatpush.msrb.mxu1 %v709_v40  ;;  %v1015_v34 = vld [vmem:[%s2088_s5 + $0xc0] sm:$0xff]  ;;  %v1046_v40 = vld [vmem:[%s2088_s5 + $0x1b8] sm:$0xff] }
  0x2d   : > { %869 = vmatpush.msrb.mxu2 %v702_v35  ;;  %829 = vmatpush.msrb.mxu0 %v700_v42  ;;  %v1031_v35 = vld [vmem:[%s2088_s5 + $0x140] sm:$0xff]  ;;  %v1013_v42 = vld [vmem:[%s2088_s5 + $0xb0] sm:$0xff] }
  0x2e   : > { %889 = vmatpush.msrb.mxu3 %v703_v41  ;;  %849 = vmatpush.msrb.mxu1 %v701_v43  ;;  %v997_v41 = vld [vmem:[%s2088_s5 + $0x30] sm:$0xff] }
  0x2f   : > { %v1029_v43 = vld [vmem:[%s2088_s5 + $0x130] sm:$0xff] }
  0x7f   : > { %v692_v1 = vpop.permute.xlu0 %691 }
  0x8f   : > { %v340_v20 = vpop.f32.mrf.mxu0  ;;  %v362_v21 = vpop.f32.mrf.mxu1 }
  0x90   : > { %v365_v25 = vmax.f32 %v340_v20, %v362_v21  ;;  %v1051_v20 = vld [vmem:[%s2088_s5 + $0x1e0] sm:$0xff]  ;;  %v1002_v21 = vld [vmem:[%s2088_s5 + $0x58] sm:$0xff] }
  0x93   : > { %v385_v26 = vpop.f32.mrf.mxu2 }
  0x94   : > { %v388_v30 = vmax.f32 %v365_v25, %v385_v26  ;;  %v1001_v25 = vld [vmem:[%s2088_s5 + $0x50] sm:$0xff] }
  0x95   : > { %v1017_v26 = vld [vmem:[%s2088_s5 + $0xd0] sm:$0xff] }
  0x96   : > { %v408_v32 = vpop.f32.mrf.mxu3 }
  0x97   : > { %v411_v36 = vmax.f32 %v388_v30, %v408_v32  ;;  %v431_v37 = vpop.f32.mrf.mxu0  ;;  %v454_v38 = vpop.f32.mrf.mxu1  ;;  %v1016_v30 = vld [vmem:[%s2088_s5 + $0xc8] sm:$0xff] }
  0x98   : > { %v1048_v32 = vld [vmem:[%s2088_s5 + $0x1c8] sm:$0xff] }
  0x99   : > { %v434_v44 = vmax.f32 %v411_v36, %v431_v37  ;;  %v1047_v36 = vld [vmem:[%s2088_s5 + $0x1c0] sm:$0xff]  ;;  %v998_v37 = vld [vmem:[%s2088_s5 + $0x38] sm:$0xff] }
  0x9b   : > { %v457_v45 = vmax.f32 %v434_v44, %v454_v38  ;;  %v477_v46 = vpop.f32.mrf.mxu2  ;;  %v1014_v38 = vld [vmem:[%s2088_s5 + $0xb8] sm:$0xff]  ;;  %v1045_v44 = vld [vmem:[%s2088_s5 + $0x1b0] sm:$0xff] }
  0x9d   : > { %v480_v47 = vmax.f32 %v457_v45, %v477_v46  ;;  %v996_v45 = vld [vmem:[%s2088_s5 + $0x28] sm:$0xff] }
  0x9e   : > { %v500_v48 = vpop.f32.mrf.mxu3  ;;  %v1012_v46 = vld [vmem:[%s2088_s5 + $0xa8] sm:$0xff] }
  0x9f   : > { %v503_v49 = vmax.f32 %v480_v47, %v500_v48  ;;  %v523_v50 = vpop.f32.mrf.mxu0  ;;  %v546_v51 = vpop.f32.mrf.mxu1  ;;  %v1028_v47 = vld [vmem:[%s2088_s5 + $0x128] sm:$0xff] }
  0xa0   : > { %v1044_v48 = vld [vmem:[%s2088_s5 + $0x1a8] sm:$0xff] }
  0xa1   : > { %v526_v52 = vmax.f32 %v503_v49, %v523_v50  ;;  %v995_v49 = vld [vmem:[%s2088_s5 + $0x20] sm:$0xff] }
  0xa2   : > { %v1011_v50 = vld [vmem:[%s2088_s5 + $0xa0] sm:$0xff] }
  0xa3   : > { %v549_v53 = vmax.f32 %v526_v52, %v546_v51  ;;  %v569_v54 = vpop.f32.mrf.mxu2  ;;  %v1027_v51 = vld [vmem:[%s2088_s5 + $0x120] sm:$0xff] }
  0xa4   : > { %v1043_v52 = vld [vmem:[%s2088_s5 + $0x1a0] sm:$0xff] }
  0xa5   : > { %v572_v55 = vmax.f32 %v549_v53, %v569_v54  ;;  %v994_v53 = vld [vmem:[%s2088_s5 + $0x18] sm:$0xff] }
  0xa6   : > { %v592_v56 = vpop.f32.mrf.mxu3  ;;  %v1010_v54 = vld [vmem:[%s2088_s5 + $0x98] sm:$0xff] }
  0xa7   : > { %v595_v57 = vmax.f32 %v572_v55, %v592_v56  ;;  %v615_v58 = vpop.f32.mrf.mxu0  ;;  %v638_v59 = vpop.f32.mrf.mxu1  ;;  %v993_v55 = vld [vmem:[%s2088_s5 + $0x10] sm:$0xff] }
  0xa8   : > { %v1009_v56 = vld [vmem:[%s2088_s5 + $0x90] sm:$0xff] }
  0xa9   : > { %v618_v60 = vmax.f32 %v595_v57, %v615_v58  ;;  %v992_v57 = vld [vmem:[%s2088_s5 + $0x8] sm:$0xff] }
  0xaa   : > { %v1008_v58 = vld [vmem:[%s2088_s5 + $0x88] sm:$0xff] }
  0xab   : > { %v641_v61 = vmax.f32 %v618_v60, %v638_v59  ;;  %v661_v62 = vpop.f32.mrf.mxu2  ;;  %v991_v59 = vld [vmem:[%s2088_s5] sm:$0xff] }
  0xac   : > { %v1007_v60 = vld [vmem:[%s2088_s5 + $0x80] sm:$0xff] }
  0xad   : > { %v664_v63 = vmax.f32 %v641_v61, %v661_v62  ;;  %v1026_v61 = vld [vmem:[%s2088_s5 + $0x118] sm:$0xff] }
  0xae   : > { %v684_v0 = vpop.f32.mrf.mxu3  ;;  %v1042_v62 = vld [vmem:[%s2088_s5 + $0x198] sm:$0xff] }
  0xaf   : > { %v687_v2 = vmax.f32 %v664_v63, %v684_v0  ;;  %v1070_v63 = vld [vmem:[%s2088_s5 + $0x278] sm:$0xff] }
  0xb0   : > { %v1086_v0 = vld [vmem:[%s2088_s5 + $0x2f8] sm:$0xff] }
  0xb1   : > { %v694_v3 = vadd.f32 %v692_v1, %v687_v2  ;;  %v1025_v1 = vld [vmem:[%s2088_s5 + $0x110] sm:$0xff] }
  0xb2   : > { %v1041_v2 = vld [vmem:[%s2088_s5 + $0x190] sm:$0xff] }
  0xb3   : > { %v695_v4 = vmax.f32 %v694_v3, 0.0  ;;  %v1069_v3 = vld [vmem:[%s2088_s5 + $0x270] sm:$0xff] }
  0xb5   : > { %1411 = vmatmul.msk.f32.vlgmr.msra.gmra.mxu0 %vm730_vm1, %v695_v4  ;;  %1412 = vmatmul.msk.f32.vlgmr.msra.gmra.mxu1 %vm730_vm1, %v695_v4 }
  0xb6   : > { %1413 = vmatmul.msk.f32.vlgmr.msra.gmra.mxu2 %vm730_vm1, %v695_v4  ;;  %1414 = vmatmul.msk.f32.vlgmr.msra.gmra.mxu3 %vm730_vm1, %v695_v4 }
  0xb7   : > { %1123 = vmatpush.msra.mxu0 %v1006_v5  ;;  %1143 = vmatpush.msra.mxu1 %v1022_v6  ;;  %v1024_v5 = vld [vmem:[%s2088_s5 + $0x108] sm:$0xff] }
  0xb8   : > { %1163 = vmatpush.msra.mxu2 %v1038_v7  ;;  %1183 = vmatpush.msra.mxu3 %v1054_v8  ;;  %v1040_v6 = vld [vmem:[%s2088_s5 + $0x188] sm:$0xff] }
  0xb9   : > { %1124 = vmatpush.msra.mxu0 %v1005_v9  ;;  %1144 = vmatpush.msra.mxu1 %v1021_v10  ;;  %v1068_v7 = vld [vmem:[%s2088_s5 + $0x268] sm:$0xff]  ;;  %v1023_v9 = vld [vmem:[%s2088_s5 + $0x100] sm:$0xff] }
  0xba   : > { %1164 = vmatpush.msra.mxu2 %v1037_v11  ;;  %1184 = vmatpush.msra.mxu3 %v1053_v12  ;;  %v1084_v8 = vld [vmem:[%s2088_s5 + $0x2e8] sm:$0xff]  ;;  %v1039_v10 = vld [vmem:[%s2088_s5 + $0x180] sm:$0xff] }
  0xbb   : > { %1125 = vmatpush.msra.mxu0 %v1004_v13  ;;  %1145 = vmatpush.msra.mxu1 %v1020_v14  ;;  %v1067_v11 = vld [vmem:[%s2088_s5 + $0x260] sm:$0xff]  ;;  %v1102_v13 = vld [vmem:[%s2088_s5 + $0x378] sm:$0xff] }
  0xbc   : > { %1165 = vmatpush.msra.mxu2 %v1036_v15  ;;  %1185 = vmatpush.msra.mxu3 %v1052_v16  ;;  %v1083_v12 = vld [vmem:[%s2088_s5 + $0x2e0] sm:$0xff]  ;;  %v1118_v14 = vld [vmem:[%s2088_s5 + $0x3f8] sm:$0xff] }
  0xbd   : > { %1415 = vmatmul.msk.f32.vlgmr.msrb.gmra.mxu0 %vm730_vm1, %v695_v4  ;;  %1416 = vmatmul.msk.f32.vlgmr.msrb.gmra.mxu1 %vm730_vm1, %v695_v4  ;;  %v1066_v15 = vld [vmem:[%s2088_s5 + $0x258] sm:$0xff] }
  0xbe   : > { %1417 = vmatmul.msk.f32.vlgmr.msrb.gmra.mxu2 %vm730_vm1, %v695_v4  ;;  %1418 = vmatmul.msk.f32.vlgmr.msrb.gmra.mxu3 %vm730_vm1, %v695_v4  ;;  %v1085_v4 = vld [vmem:[%s2088_s5 + $0x2f0] sm:$0xff]  ;;  %v1082_v16 = vld [vmem:[%s2088_s5 + $0x2d8] sm:$0xff] }
  0xbf   : > { %1126 = vmatpush.msra.mxu0 %v1003_v17  ;;  %1146 = vmatpush.msra.mxu1 %v1019_v18  ;;  %v1101_v17 = vld [vmem:[%s2088_s5 + $0x370] sm:$0xff] }
  0xc0   : > { %1166 = vmatpush.msra.mxu2 %v1035_v19  ;;  %1186 = vmatpush.msra.mxu3 %v1051_v20  ;;  %v1117_v18 = vld [vmem:[%s2088_s5 + $0x3f0] sm:$0xff] }
  0xc1   : > { %1127 = vmatpush.msra.mxu0 %v1002_v21  ;;  %1147 = vmatpush.msra.mxu1 %v1018_v22  ;;  %v1065_v19 = vld [vmem:[%s2088_s5 + $0x250] sm:$0xff]  ;;  %v1100_v21 = vld [vmem:[%s2088_s5 + $0x368] sm:$0xff] }
  0xc2   : > { %1167 = vmatpush.msra.mxu2 %v1034_v23  ;;  %1187 = vmatpush.msra.mxu3 %v1050_v24  ;;  %v1081_v20 = vld [vmem:[%s2088_s5 + $0x2d0] sm:$0xff]  ;;  %v1116_v22 = vld [vmem:[%s2088_s5 + $0x3e8] sm:$0xff] }
  0xc3   : > { %1128 = vmatpush.msra.mxu0 %v1001_v25  ;;  %1148 = vmatpush.msra.mxu1 %v1017_v26  ;;  %v1064_v23 = vld [vmem:[%s2088_s5 + $0x248] sm:$0xff]  ;;  %v1099_v25 = vld [vmem:[%s2088_s5 + $0x360] sm:$0xff] }
  0xc4   : > { %1168 = vmatpush.msra.mxu2 %v1033_v27  ;;  %1188 = vmatpush.msra.mxu3 %v1049_v28  ;;  %v1080_v24 = vld [vmem:[%s2088_s5 + $0x2c8] sm:$0xff]  ;;  %v1115_v26 = vld [vmem:[%s2088_s5 + $0x3e0] sm:$0xff] }
  0xc5   : > { %1129 = vmatpush.msra.mxu0 %v1000_v29  ;;  %1149 = vmatpush.msra.mxu1 %v1016_v30  ;;  %v1063_v27 = vld [vmem:[%s2088_s5 + $0x240] sm:$0xff]  ;;  %v1098_v29 = vld [vmem:[%s2088_s5 + $0x358] sm:$0xff] }
  0xc6   : > { %1169 = vmatpush.msra.mxu2 %v1032_v31  ;;  %1189 = vmatpush.msra.mxu3 %v1048_v32  ;;  %v1079_v28 = vld [vmem:[%s2088_s5 + $0x2c0] sm:$0xff]  ;;  %v1114_v30 = vld [vmem:[%s2088_s5 + $0x3d8] sm:$0xff] }
  0xc7   : > { %1130 = vmatpush.msra.mxu0 %v999_v33  ;;  %1150 = vmatpush.msra.mxu1 %v1015_v34  ;;  %v1062_v31 = vld [vmem:[%s2088_s5 + $0x238] sm:$0xff]  ;;  %v1097_v33 = vld [vmem:[%s2088_s5 + $0x350] sm:$0xff] }
  0xc8   : > { %1170 = vmatpush.msra.mxu2 %v1031_v35  ;;  %1190 = vmatpush.msra.mxu3 %v1047_v36  ;;  %v1078_v32 = vld [vmem:[%s2088_s5 + $0x2b8] sm:$0xff]  ;;  %v1113_v34 = vld [vmem:[%s2088_s5 + $0x3d0] sm:$0xff] }
  0xc9   : > { %1131 = vmatpush.msra.mxu0 %v998_v37  ;;  %1151 = vmatpush.msra.mxu1 %v1014_v38  ;;  %v1061_v35 = vld [vmem:[%s2088_s5 + $0x230] sm:$0xff]  ;;  %v1096_v37 = vld [vmem:[%s2088_s5 + $0x348] sm:$0xff] }
  0xca   : > { %1171 = vmatpush.msra.mxu2 %v1030_v39  ;;  %1191 = vmatpush.msra.mxu3 %v1046_v40  ;;  %v1077_v36 = vld [vmem:[%s2088_s5 + $0x2b0] sm:$0xff]  ;;  %v1112_v38 = vld [vmem:[%s2088_s5 + $0x3c8] sm:$0xff] }
  0xcb   : > { %1132 = vmatpush.msra.mxu0 %v997_v41  ;;  %1152 = vmatpush.msra.mxu1 %v1013_v42  ;;  %v1060_v39 = vld [vmem:[%s2088_s5 + $0x228] sm:$0xff]  ;;  %v1095_v41 = vld [vmem:[%s2088_s5 + $0x340] sm:$0xff] }
  0xcc   : > { %1172 = vmatpush.msra.mxu2 %v1029_v43  ;;  %1192 = vmatpush.msra.mxu3 %v1045_v44  ;;  %v1076_v40 = vld [vmem:[%s2088_s5 + $0x2a8] sm:$0xff]  ;;  %v1111_v42 = vld [vmem:[%s2088_s5 + $0x3c0] sm:$0xff] }
  0xcd   : > { %1133 = vmatpush.msra.mxu0 %v996_v45  ;;  %1153 = vmatpush.msra.mxu1 %v1012_v46  ;;  %v1059_v43 = vld [vmem:[%s2088_s5 + $0x220] sm:$0xff]  ;;  %v1094_v45 = vld [vmem:[%s2088_s5 + $0x338] sm:$0xff] }
  0xce   : > { %1173 = vmatpush.msra.mxu2 %v1028_v47  ;;  %1193 = vmatpush.msra.mxu3 %v1044_v48  ;;  %v1075_v44 = vld [vmem:[%s2088_s5 + $0x2a0] sm:$0xff]  ;;  %v1110_v46 = vld [vmem:[%s2088_s5 + $0x3b8] sm:$0xff] }
  0xcf   : > { %1134 = vmatpush.msra.mxu0 %v995_v49  ;;  %1154 = vmatpush.msra.mxu1 %v1011_v50  ;;  %v1935_v47 = vld [vmem:[%s2087_s4] sm:$0xff]  ;;  %v1058_v48 = vld [vmem:[%s2088_s5 + $0x218] sm:$0xff]  ;;  %v1093_v50 = vld [vmem:[%s2088_s5 + $0x330] sm:$0xff] }
  0xd0   : > { %1174 = vmatpush.msra.mxu2 %v1027_v51  ;;  %1194 = vmatpush.msra.mxu3 %v1043_v52  ;;  %v1074_v49 = vld [vmem:[%s2088_s5 + $0x298] sm:$0xff]  ;;  %v1109_v51 = vld [vmem:[%s2088_s5 + $0x3b0] sm:$0xff] }
  0xd1   : > { %1135 = vmatpush.msra.mxu0 %v994_v53  ;;  %1155 = vmatpush.msra.mxu1 %v1010_v54  ;;  %v1057_v52 = vld [vmem:[%s2088_s5 + $0x210] sm:$0xff]  ;;  %v1092_v54 = vld [vmem:[%s2088_s5 + $0x328] sm:$0xff] }
  0xd2   : > { %1175 = vmatpush.msra.mxu2 %v1026_v61  ;;  %1195 = vmatpush.msra.mxu3 %v1042_v62  ;;  %v1073_v53 = vld [vmem:[%s2088_s5 + $0x290] sm:$0xff]  ;;  %v1107_v61 = vld [vmem:[%s2088_s5 + $0x3a0] sm:$0xff] }
  0xd3   : > { %1136 = vmatpush.msra.mxu0 %v993_v55  ;;  %1156 = vmatpush.msra.mxu1 %v1009_v56  ;;  %v1108_v55 = vld [vmem:[%s2088_s5 + $0x3a8] sm:$0xff] }
  0xd4   : > { %1176 = vmatpush.msra.mxu2 %v1025_v1  ;;  %1196 = vmatpush.msra.mxu3 %v1041_v2  ;;  %v1056_v56 = vld [vmem:[%s2088_s5 + $0x208] sm:$0xff]  ;;  %v1055_v2 = vld [vmem:[%s2088_s5 + $0x200] sm:$0xff] }
  0xd5   : > { %1137 = vmatpush.msra.mxu0 %v992_v57  ;;  %1157 = vmatpush.msra.mxu1 %v1008_v58  ;;  %v1072_v57 = vld [vmem:[%s2088_s5 + $0x288] sm:$0xff]  ;;  %v714_v58 = vperm.slane %v1935_v47, 0 }
  0xd6   : > { %1177 = vmatpush.msra.mxu2 %v1024_v5  ;;  %1197 = vmatpush.msra.mxu3 %v1040_v6  ;;  %v1106_v5 = vld [vmem:[%s2088_s5 + $0x398] sm:$0xff] }
  0xd7   : > { %1138 = vmatpush.msra.mxu0 %v991_v59  ;;  %1158 = vmatpush.msra.mxu1 %v1007_v60  ;;  %v715_v59 = vperm.slane %v1935_v47, 1  ;;  %v1091_v60 = vld [vmem:[%s2088_s5 + $0x320] sm:$0xff] }
  0xd8   : > { %1178 = vmatpush.msra.mxu2 %v1023_v9  ;;  %1198 = vmatpush.msra.mxu3 %v1039_v10  ;;  %v1089_v9 = vld [vmem:[%s2088_s5 + $0x310] sm:$0xff] }
  0xd9   : > { %1203 = vmatpush.msrb.mxu0 %v1070_v63  ;;  %1223 = vmatpush.msrb.mxu1 %v1086_v0  ;;  %v1105_v10 = vld [vmem:[%s2088_s5 + $0x390] sm:$0xff] }
  0xda   : > { %1243 = vmatpush.msrb.mxu2 %v1102_v13  ;;  %1263 = vmatpush.msrb.mxu3 %v1118_v14  ;;  %v718_v13 = vperm.slane %v1935_v47, 4  ;;  %v1088_v14 = vld [vmem:[%s2088_s5 + $0x308] sm:$0xff] }
  0xdb   : > { %1204 = vmatpush.msrb.mxu0 %v1069_v3  ;;  %1224 = vmatpush.msrb.mxu1 %v1085_v4  ;;  %v1071_v3 = vld [vmem:[%s2088_s5 + $0x280] sm:$0xff]  ;;  %v1090_v4 = vld [vmem:[%s2088_s5 + $0x318] sm:$0xff] }
  0xdc   : > { %1244 = vmatpush.msrb.mxu2 %v1101_v17  ;;  %1264 = vmatpush.msrb.mxu3 %v1117_v18 }
  0xdd   : > { %1205 = vmatpush.msrb.mxu0 %v1068_v7  ;;  %1225 = vmatpush.msrb.mxu1 %v1084_v8 }
  0xde   : > { %1245 = vmatpush.msrb.mxu2 %v1100_v21  ;;  %1265 = vmatpush.msrb.mxu3 %v1116_v22 }
  0xdf   : > { %1206 = vmatpush.msrb.mxu0 %v1067_v11  ;;  %1226 = vmatpush.msrb.mxu1 %v1083_v12  ;;  %v716_v11 = vperm.slane %v1935_v47, 2  ;;  %v717_v12 = vperm.slane %v1935_v47, 3 }
  0xe0   : > { %1246 = vmatpush.msrb.mxu2 %v1099_v25  ;;  %1266 = vmatpush.msrb.mxu3 %v1115_v26  ;;  %v1103_v25 = vld [vmem:[%s2088_s5 + $0x380] sm:$0xff] }
  0xe1   : > { %1207 = vmatpush.msrb.mxu0 %v1066_v15  ;;  %1227 = vmatpush.msrb.mxu1 %v1082_v16  ;;  %v1104_v15 = vld [vmem:[%s2088_s5 + $0x388] sm:$0xff] }
  0xe2   : > { %1247 = vmatpush.msrb.mxu2 %v1098_v29  ;;  %1267 = vmatpush.msrb.mxu3 %v1114_v30  ;;  %v720_v30 = vperm.slane %v1935_v47, 6 }
  0xe3   : > { %1208 = vmatpush.msrb.mxu0 %v1065_v19  ;;  %1228 = vmatpush.msrb.mxu1 %v1081_v20  ;;  %v719_v19 = vperm.slane %v1935_v47, 5  ;;  %v1087_v20 = vld [vmem:[%s2088_s5 + $0x300] sm:$0xff] }
  0xe4   : > { %1248 = vmatpush.msrb.mxu2 %v1097_v33  ;;  %1268 = vmatpush.msrb.mxu3 %v1113_v34 }
  0xe5   : > { %1209 = vmatpush.msrb.mxu0 %v1064_v23  ;;  %1229 = vmatpush.msrb.mxu1 %v1080_v24 }
  0xe6   : > { %1249 = vmatpush.msrb.mxu2 %v1096_v37  ;;  %1269 = vmatpush.msrb.mxu3 %v1112_v38  ;;  %v721_v38 = vperm.slane %v1935_v47, 7 }
  0xe7   : > { %1210 = vmatpush.msrb.mxu0 %v1063_v27  ;;  %1230 = vmatpush.msrb.mxu1 %v1079_v28 }
  0xe8   : > { %1250 = vmatpush.msrb.mxu2 %v1095_v41  ;;  %1270 = vmatpush.msrb.mxu3 %v1111_v42 }
  0xe9   : > { %1211 = vmatpush.msrb.mxu0 %v1062_v31  ;;  %1231 = vmatpush.msrb.mxu1 %v1078_v32 }
  0xea   : > { %1251 = vmatpush.msrb.mxu2 %v1094_v45  ;;  %1271 = vmatpush.msrb.mxu3 %v1110_v46 }
  0xeb   : > { %1212 = vmatpush.msrb.mxu0 %v1061_v35  ;;  %1232 = vmatpush.msrb.mxu1 %v1077_v36 }
  0xec   : > { %1252 = vmatpush.msrb.mxu2 %v1093_v50  ;;  %1272 = vmatpush.msrb.mxu3 %v1109_v51 }
  0xed   : > { %1213 = vmatpush.msrb.mxu0 %v1060_v39  ;;  %1233 = vmatpush.msrb.mxu1 %v1076_v40 }
  0xee   : > { %1253 = vmatpush.msrb.mxu2 %v1092_v54  ;;  %1273 = vmatpush.msrb.mxu3 %v1108_v55 }
  0xef   : > { %1214 = vmatpush.msrb.mxu0 %v1059_v43  ;;  %1234 = vmatpush.msrb.mxu1 %v1075_v44 }
  0xf0   : > { %1254 = vmatpush.msrb.mxu2 %v1091_v60  ;;  %1274 = vmatpush.msrb.mxu3 %v1107_v61 }
  0xf1   : > { %1215 = vmatpush.msrb.mxu0 %v1058_v48  ;;  %1235 = vmatpush.msrb.mxu1 %v1074_v49 }
  0xf2   : > { %1255 = vmatpush.msrb.mxu2 %v1090_v4  ;;  %1275 = vmatpush.msrb.mxu3 %v1106_v5 }
  0xf3   : > { %1216 = vmatpush.msrb.mxu0 %v1057_v52  ;;  %1236 = vmatpush.msrb.mxu1 %v1073_v53 }
  0xf4   : > { %1256 = vmatpush.msrb.mxu2 %v1089_v9  ;;  %1276 = vmatpush.msrb.mxu3 %v1105_v10 }
  0xf5   : > { %1217 = vmatpush.msrb.mxu0 %v1056_v56  ;;  %1237 = vmatpush.msrb.mxu1 %v1072_v57 }
  0xf6   : > { %1257 = vmatpush.msrb.mxu2 %v1088_v14  ;;  %1277 = vmatpush.msrb.mxu3 %v1104_v15 }
  0xf7   : > { %1218 = vmatpush.msrb.mxu0 %v1055_v2  ;;  %1238 = vmatpush.msrb.mxu1 %v1071_v3 }
  0xf8   : > { %1258 = vmatpush.msrb.mxu2 %v1087_v20  ;;  %1278 = vmatpush.msrb.mxu3 %v1103_v25 }
 0x132   : > { %v751_v62 = vpop.f32.mrf.mxu0  ;;  %v771_v63 = vpop.f32.mrf.mxu1 }
 0x133   : > { %v1976_v0 = vadd.f32 %v751_v62, %v714_v58  ;;  %v1978_v1 = vadd.f32 %v771_v63, %v715_v59 }
 0x135   : > { %v927_v6 = vmul.f32 %v1976_v0, %v1976_v0  ;;  %v902_v7 = vrot.slane %v1978_v1, 4  ;;  %v928_v8 = vmul.f32 %v1978_v1, %v1978_v1  ;;  %v919_v60 = vmul.f32 0.5, %v1976_v0 }
 0x137   : > { %v935_v16 = vmul.f32 %v927_v6, %v1976_v0  ;;  %v907_v17 = vsel %vm906_vm2, %v1976_v0, %v902_v7  ;;  %v936_v18 = vmul.f32 %v928_v8, %v1978_v1 }
 0x138   : > { %915 = vst [vmem:[%s1997_s16] sm:$0xff] %v907_v17 }
 0x139   : > { %v943_v21 = vmul.f32 0.044715, %v935_v16  ;;  %v944_v22 = vmul.f32 0.044715, %v936_v18  ;;  %v791_v23 = vpop.f32.mrf.mxu2  ;;  %v811_v24 = vpop.f32.mrf.mxu3 }
 0x13a   : > { %v2029_v26 = vadd.f32 %v791_v23, %v716_v11  ;;  %v2031_v27 = vadd.f32 %v811_v24, %v717_v12  ;;  %v831_v28 = vpop.f32.mrf.mxu0  ;;  %v851_v29 = vpop.f32.mrf.mxu1 }
 0x13b   : > { %v2034_v31 = vadd.f32 %v831_v28, %v718_v13  ;;  %v2036_v32 = vadd.f32 %v851_v29, %v719_v19  ;;  %v951_v33 = vadd.f32 %v943_v21, %v1976_v0  ;;  %v952_v34 = vadd.f32 %v944_v22, %v1978_v1 }
 0x13c   : > { %v929_v35 = vmul.f32 %v2029_v26, %v2029_v26  ;;  %v903_v36 = vrot.slane %v2031_v27, 4  ;;  %v930_v37 = vmul.f32 %v2031_v27, %v2031_v27  ;;  %v920_v0 = vmul.f32 0.5, %v1978_v1 }
 0x13d   : > { %v931_v39 = vmul.f32 %v2034_v31, %v2034_v31  ;;  %v904_v40 = vrot.slane %v2036_v32, 4  ;;  %v932_v41 = vmul.f32 %v2036_v32, %v2036_v32  ;;  %v959_v42 = vmul.f32 0.7978846, %v951_v33 }
 0x13e   : > { %v937_v43 = vmul.f32 %v929_v35, %v2029_v26  ;;  %v908_v44 = vsel %vm906_vm2, %v2029_v26, %v903_v36  ;;  %v938_v45 = vmul.f32 %v930_v37, %v2031_v27  ;;  %v960_v46 = vmul.f32 0.7978846, %v952_v34 }
 0x13f   : > { %916 = vst [vmem:[%s1997_s16 + $0x8] sm:$0xff] %v908_v44  ;;  %v939_v47 = vmul.f32 %v931_v39, %v2034_v31  ;;  %v909_v48 = vsel %vm906_vm2, %v2034_v31, %v904_v40  ;;  %v940_v49 = vmul.f32 %v932_v41, %v2036_v32  ;;  %1434 = vtanh.f32 %v959_v42 }
 0x140   : > { %v945_v50 = vmul.f32 0.044715, %v937_v43  ;;  %v946_v51 = vmul.f32 0.044715, %v938_v45  ;;  %917 = vst [vmem:[%s1997_s16 + $0x10] sm:$0xff] %v909_v48  ;;  %1436 = vtanh.f32 %v960_v46  ;;  %v921_v25 = vmul.f32 0.5, %v2029_v26 }
 0x141   : > { %v947_v52 = vmul.f32 0.044715, %v939_v47  ;;  %v948_v53 = vmul.f32 0.044715, %v940_v49  ;;  %v871_v54 = vpop.f32.mrf.mxu2  ;;  %v891_v55 = vpop.f32.mrf.mxu3  ;;  %v922_v29 = vmul.f32 0.5, %v2031_v27  ;;  %v923_v35 = vmul.f32 0.5, %v2034_v31 }
 0x142   : > { %v872_v56 = vadd.f32 %v871_v54, %v720_v30  ;;  %v892_v57 = vadd.f32 %v891_v55, %v721_v38  ;;  %v953_v58 = vadd.f32 %v945_v50, %v2029_v26  ;;  %v954_v59 = vadd.f32 %v946_v51, %v2031_v27 }
 0x143   : > { %v955_v61 = vadd.f32 %v947_v52, %v2034_v31  ;;  %v956_v62 = vadd.f32 %v948_v53, %v2036_v32  ;;  %v924_v38 = vmul.f32 0.5, %v2036_v32  ;;  %v1433_v31 = vld [vmem:[%s2089_s6] ss:$0 sm:$0xff] }
 0x144   : > { %v933_v63 = vmul.f32 %v872_v56, %v872_v56  ;;  %v905_v2 = vrot.slane %v892_v57, 4  ;;  %v934_v3 = vmul.f32 %v892_v57, %v892_v57  ;;  %v961_v4 = vmul.f32 0.7978846, %v953_v58 }
 0x145   : > { %v1435_v5 = vpop.eup %1434  ;;  %v962_v6 = vmul.f32 0.7978846, %v954_v59  ;;  %v963_v7 = vmul.f32 0.7978846, %v955_v61  ;;  %v964_v8 = vmul.f32 0.7978846, %v956_v62 }
 0x146   : > { %v1437_v9 = vpop.eup %1436  ;;  %v941_v10 = vmul.f32 %v933_v63, %v872_v56  ;;  %v910_v11 = vsel %vm906_vm2, %v872_v56, %v905_v2  ;;  %v942_v12 = vmul.f32 %v934_v3, %v892_v57  ;;  %v975_v13 = vadd.f32 1.0, %v1435_v5 }
 0x147   : > { %918 = vst [vmem:[%s1997_s16 + $0x18] sm:$0xff] %v910_v11  ;;  %v976_v14 = vadd.f32 1.0, %v1437_v9  ;;  %1438 = vtanh.f32 %v961_v4  ;;  %v925_v27 = vmul.f32 0.5, %v872_v56  ;;  %v926_v44 = vmul.f32 0.5, %v892_v57 }
 0x148   : > { %v949_v15 = vmul.f32 0.044715, %v941_v10  ;;  %v950_v16 = vmul.f32 0.044715, %v942_v12  ;;  %v983_v17 = vmul.f32 %v975_v13, %v919_v60  ;;  %1440 = vtanh.f32 %v962_v6 }
 0x149   : > { %v984_v18 = vmul.f32 %v976_v14, %v920_v0  ;;  %1442 = vtanh.f32 %v963_v7 }
 0x14a   : > { %1139 = vmatmul.f32.vlgmr.msra.gmra.mxu0 %v983_v17  ;;  %1444 = vtanh.f32 %v964_v8  ;;  %v957_v19 = vadd.f32 %v949_v15, %v872_v56  ;;  %v958_v20 = vadd.f32 %v950_v16, %v892_v57 }
 0x14b   : > { %1159 = vmatmul.f32.vlgmr.msra.gmra.mxu1 %v984_v18 }
 0x14c   : > { %v965_v21 = vmul.f32 0.7978846, %v957_v19  ;;  %v966_v22 = vmul.f32 0.7978846, %v958_v20 }
 0x14d   : > { %v1439_v23 = vpop.eup %1438 }
 0x14e   : > { %v1441_v24 = vpop.eup %1440  ;;  %v977_v1 = vadd.f32 1.0, %v1439_v23  ;;  %1446 = vtanh.f32 %v965_v21 }
 0x14f   : > { %v1443_v28 = vpop.eup %1442  ;;  %v978_v30 = vadd.f32 1.0, %v1441_v24  ;;  %1448 = vtanh.f32 %v966_v22 }
 0x150   : > { %v1445_v33 = vpop.eup %1444  ;;  %v985_v34 = vmul.f32 %v977_v1, %v921_v25  ;;  %v979_v36 = vadd.f32 1.0, %v1443_v28 }
 0x151   : > { %v986_v37 = vmul.f32 %v978_v30, %v922_v29  ;;  %v980_v39 = vadd.f32 1.0, %v1445_v33 }
 0x152   : > { %1179 = vmatmul.f32.vlgmr.msra.gmra.mxu2 %v985_v34  ;;  %v987_v40 = vmul.f32 %v979_v36, %v923_v35 }
 0x153   : > { %1199 = vmatmul.f32.vlgmr.msra.gmra.mxu3 %v986_v37  ;;  %v988_v26 = vmul.f32 %v980_v39, %v924_v38 }
 0x154   : > { %v1447_v41 = vpop.eup %1446  ;;  %1219 = vmatmul.f32.vlgmr.msrb.gmra.mxu0 %v987_v40 }
 0x155   : > { %v1449_v42 = vpop.eup %1448  ;;  %1239 = vmatmul.f32.vlgmr.msrb.gmra.mxu1 %v988_v26  ;;  %v981_v43 = vadd.f32 1.0, %v1447_v41 }
 0x156   : > { %v982_v45 = vadd.f32 1.0, %v1449_v42 }
 0x157   : > { %v989_v46 = vmul.f32 %v981_v43, %v925_v27 }
 0x158   : > { %v990_v47 = vmul.f32 %v982_v45, %v926_v44 }
 0x15a   : > { %1259 = vmatmul.f32.vlgmr.msrb.gmra.mxu2 %v989_v46 }
 0x15b   : > { %1279 = vmatmul.f32.vlgmr.msrb.gmra.mxu3 %v990_v47 }
 0x1c7   : > { %v1140_v32 = vpop.f32.mrf.mxu0 }
 0x1c8   : > { %v1141_v48 = vadd.f32 %v1433_v31, %v1140_v32  ;;  %v1160_v49 = vpop.f32.mrf.mxu1 }
 0x1ca   : > { %v1161_v50 = vadd.f32 %v1160_v49, %v1141_v48 }
 0x1d1   : > { %v1220_v55 = vpop.f32.mrf.mxu0 }
 0x1d2   : > { %v1240_v57 = vpop.f32.mrf.mxu1 }
 0x1d5   : > { %v1180_v51 = vpop.f32.mrf.mxu2 }
 0x1d6   : > { %v1181_v52 = vadd.f32 %v1180_v51, %v1161_v50  ;;  %v1200_v53 = vpop.f32.mrf.mxu3 }
 0x1d8   : > { %v1201_v54 = vadd.f32 %v1200_v53, %v1181_v52 }
 0x1da   : > { %v1221_v56 = vadd.f32 %v1220_v55, %v1201_v54 }
 0x1dc   : > { %v1241_v58 = vadd.f32 %v1240_v57, %v1221_v56 }
 0x1dd   : > { %v1260_v59 = vpop.f32.mrf.mxu2 }
 0x1de   : > { %v1261_v60 = vadd.f32 %v1260_v59, %v1241_v58  ;;  %v1280_v61 = vpop.f32.mrf.mxu3 }
 0x1e0   : > { %v1281_v62 = vadd.f32 %v1280_v61, %v1261_v60 }
 0x1e2   : > { %1283 = vst [vmem:[%s316_s14] sm:$0xf] %v1281_v62 }
 0x1e3 PF: > { %s19_s27 = sadd.s32 1, %s1456_s27  }
 0x1e4   : > { %p16_p4 = scmp.ge.s32.totalorder %s19_s27, 4  }
 0x1e6   :  { %18 = sbr.rel (!%p16_p4) target bundleno = 1 (0x1), region = 105 }

</bundles_post_ra>
